<compile_context>
chip_gen: v6e
topology: v6e:2x2x1
jax: 0.10.0
libtpu: 0.0.40
codegen_flags: <defaults>
</compile_context>

<pallas_src>
import jax
import jax.numpy as jnp
from jax.experimental import pallas as pl
from jax.experimental.pallas import tpu as pltpu

# Model dims. `INPUT_DIM` stands in for vectorizer.max_features (synthetic value).
INPUT_DIM = 512
HIDDEN_DIM = 256
HIDDEN2_DIM = HIDDEN_DIM // 2
OUTPUT_DIM = 7
OUT_PAD = 128  # lane-dense padded output width; columns [7:128] of w3/b3 are zero


def _round_up(x, m):
    return (x + m - 1) // m * m


def mlp_kernel(x_ref, w1_ref, b1_ref, w2_ref, b2_ref, w3_ref, b3_ref, o_ref):
    # Layer 1: Linear(INPUT_DIM, HIDDEN_DIM) + ReLU   (Dropout(0.5) = identity in eval)
    h1 = jnp.dot(x_ref[...], w1_ref[...], preferred_element_type=jnp.float32)
    h1 = jnp.maximum(h1 + b1_ref[...], 0.0).astype(jnp.bfloat16)
    # Layer 2: Linear(HIDDEN_DIM, HIDDEN2_DIM) + ReLU (Dropout(0.3) = identity in eval)
    h2 = jnp.dot(h1, w2_ref[...], preferred_element_type=jnp.float32)
    h2 = jnp.maximum(h2 + b2_ref[...], 0.0).astype(jnp.bfloat16)
    # Layer 3: Linear(HIDDEN2_DIM, OUT_PAD)  (padded columns are zero; sliced in wrapper)
    out = jnp.dot(h2, w3_ref[...], preferred_element_type=jnp.float32) + b3_ref[...]
    o_ref[...] = out.astype(o_ref.dtype)


def mlp_forward(x, params, *, tile_m=256):
    """x: (B, INPUT_DIM) f32/bf16. params: prepared (bf16 weights, f32 biases, padded w3/b3)."""
    w1, b1, w2, b2, w3, b3 = params
    B = x.shape[0]

    # Batch tile: multiple of 8 (f32/bf16 sublane friendly); cap at tile_m (>= MXU height).
    tm = min(tile_m, _round_up(B, 8))
    b_pad = _round_up(B, tm)

    x = x.astype(jnp.bfloat16)
    if b_pad != B:
        x = jnp.pad(x, ((0, b_pad - B), (0, 0)))

    grid = (b_pad // tm,)
    const = lambda i: (0, 0)  # weights / biases: same block every step -> VMEM-resident

    out_padded = pl.pallas_call(
        mlp_kernel,
        out_shape=jax.ShapeDtypeStruct((b_pad, OUT_PAD), jnp.float32),
        grid=grid,
        in_specs=[
            pl.BlockSpec((tm, INPUT_DIM), lambda i: (i, 0)),
            pl.BlockSpec((INPUT_DIM, HIDDEN_DIM), const),
            pl.BlockSpec((1, HIDDEN_DIM), const),
            pl.BlockSpec((HIDDEN_DIM, HIDDEN2_DIM), const),
            pl.BlockSpec((1, HIDDEN2_DIM), const),
            pl.BlockSpec((HIDDEN2_DIM, OUT_PAD), const),
            pl.BlockSpec((1, OUT_PAD), const),
        ],
        out_specs=pl.BlockSpec((tm, OUT_PAD), lambda i: (i, 0)),
        compiler_params=pltpu.CompilerParams(
            dimension_semantics=("parallel",),   # shard batch tiles across TCs on v7x
            vmem_limit_bytes=8 << 20,            # realistic budget; safe on v7x's 64 MiB VMEM
        ),
    )(x, w1, b1, w2, b2, w3, b3)

    # Slice away batch padding and the lane padding of the 7-wide output.
    return out_padded[:B, :OUTPUT_DIM]


def init_linear(key, fan_in, fan_out):
    # Match PyTorch nn.Linear default init: U(-1/sqrt(fan_in), 1/sqrt(fan_in))
    kw, kb = jax.random.split(key)
    bound = 1.0 / jnp.sqrt(float(fan_in))
    w = jax.random.uniform(kw, (fan_in, fan_out), jnp.float32, -bound, bound)
    b = jax.random.uniform(kb, (1, fan_out), jnp.float32, -bound, bound)
    return w, b


def prepare_params(w1, b1, w2, b2, w3, b3):
    """Cast weights to bf16 and zero-pad the last layer to a lane-dense width."""
    w3p = jnp.zeros((HIDDEN2_DIM, OUT_PAD), jnp.float32).at[:, :OUTPUT_DIM].set(w3)
    b3p = jnp.zeros((1, OUT_PAD), jnp.float32).at[:, :OUTPUT_DIM].set(b3)
    return (
        w1.astype(jnp.bfloat16), b1.astype(jnp.float32),
        w2.astype(jnp.bfloat16), b2.astype(jnp.float32),
        w3p.astype(jnp.bfloat16), b3p.astype(jnp.float32),
    )


if __name__ == "__main__":
    key = jax.random.PRNGKey(0)
    k_x, k1, k2, k3 = jax.random.split(key, 4)

    batch = 512  # two 256-row tiles -> exercises the batch grid (and both TCs on v7x)
    x = jax.random.normal(k_x, (batch, INPUT_DIM), jnp.float32)

    w1, b1 = init_linear(k1, INPUT_DIM, HIDDEN_DIM)
    w2, b2 = init_linear(k2, HIDDEN_DIM, HIDDEN_DIM // 2)
    w3, b3 = init_linear(k3, HIDDEN_DIM // 2, OUTPUT_DIM)
    params = prepare_params(w1, b1, w2, b2, w3, b3)

    out = mlp_forward(x, params)
    jax.block_until_ready(out)

    # Reference in plain JAX using the same bf16-cast weights (dropout = identity at inference).
    w1f = params[0].astype(jnp.float32)
    w2f = params[2].astype(jnp.float32)
    w3f = params[4].astype(jnp.float32)[:, :OUTPUT_DIM]
    b3f = params[5].astype(jnp.float32)[:, :OUTPUT_DIM]
    ref = jnp.maximum(x @ w1f + b1, 0.0)
    ref = jnp.maximum(ref @ w2f + b2, 0.0)
    ref = ref @ w3f + b3f

    assert out.shape == (batch, OUTPUT_DIM)
    # bf16 activations/weights -> looser tolerance than the old pure-f32 check.
    assert jnp.allclose(out, ref, atol=5e-2, rtol=5e-2), float(jnp.max(jnp.abs(out - ref)))

    print("KERNEL_OK")
</pallas_src>

<mosaic_0001>
module attributes {stable_mosaic.version = 11 : i64} {
  func.func @mlp_kernel(%arg0: i32, %arg1: memref<256x512xbf16, #tpu.memory_space<vmem>>, %arg2: memref<512x256xbf16, #tpu.memory_space<vmem>>, %arg3: memref<1x256xf32, #tpu.memory_space<vmem>>, %arg4: memref<256x128xbf16, #tpu.memory_space<vmem>>, %arg5: memref<1x128xf32, #tpu.memory_space<vmem>>, %arg6: memref<128x128xbf16, #tpu.memory_space<vmem>>, %arg7: memref<1x128xf32, #tpu.memory_space<vmem>>, %arg8: memref<256x128xf32, #tpu.memory_space<vmem>>) attributes {dimension_semantics = [#tpu.dimension_semantics<parallel>], iteration_bounds = array<i64: 2>, scalar_prefetch = 0 : i64, scratch_operands = 0 : i64, tpu.core_type = #tpu.core_type<tc>, window_params = [{transform_indices = @transform_0, window_bounds = array<i64: 256, 512>}, {pipeline_mode = #tpu.pipeline_mode<synchronous>, transform_indices = @transform_1, window_bounds = array<i64: 512, 256>}, {pipeline_mode = #tpu.pipeline_mode<synchronous>, transform_indices = @transform_2, window_bounds = array<i64: 1, 256>}, {pipeline_mode = #tpu.pipeline_mode<synchronous>, transform_indices = @transform_3, window_bounds = array<i64: 256, 128>}, {pipeline_mode = #tpu.pipeline_mode<synchronous>, transform_indices = @transform_4, window_bounds = array<i64: 1, 128>}, {pipeline_mode = #tpu.pipeline_mode<synchronous>, transform_indices = @transform_5, window_bounds = array<i64: 128, 128>}, {pipeline_mode = #tpu.pipeline_mode<synchronous>, transform_indices = @transform_6, window_bounds = array<i64: 1, 128>}, {transform_indices = @transform_7, window_bounds = array<i64: 256, 128>}]} {
    %c0 = arith.constant 0 : index
    %c0_0 = arith.constant 0 : index
    %0 = vector.load %arg1[%c0, %c0_0] : memref<256x512xbf16, #tpu.memory_space<vmem>>, vector<256x512xbf16>
    %c0_1 = arith.constant 0 : index
    %c0_2 = arith.constant 0 : index
    %1 = vector.load %arg2[%c0_1, %c0_2] : memref<512x256xbf16, #tpu.memory_space<vmem>>, vector<512x256xbf16>
    %cst = arith.constant dense<0.000000e+00> : vector<256x256xf32>
    %2 = tpu.matmul %0, %1, %cst {dimension_numbers = #tpu.dot_dimension_numbers<[1], [0], [0], [1], [0, 0, 1, 1], [], []>} : vector<256x512xbf16>, vector<512x256xbf16>, vector<256x256xf32> -> vector<256x256xf32>
    %c0_3 = arith.constant 0 : index
    %c0_4 = arith.constant 0 : index
    %3 = vector.load %arg3[%c0_3, %c0_4] : memref<1x256xf32, #tpu.memory_space<vmem>>, vector<1x256xf32>
    %4 = vector.broadcast %3 : vector<1x256xf32> to vector<256x256xf32>
    %5 = arith.addf %2, %4 : vector<256x256xf32>
    %cst_5 = arith.constant 0.000000e+00 : f32
    %6 = vector.broadcast %cst_5 : f32 to vector<256x256xf32>
    %7 = arith.maximumf %5, %6 : vector<256x256xf32>
    %8 = arith.truncf %7 : vector<256x256xf32> to vector<256x256xbf16>
    %c0_6 = arith.constant 0 : index
    %c0_7 = arith.constant 0 : index
    %9 = vector.load %arg4[%c0_6, %c0_7] : memref<256x128xbf16, #tpu.memory_space<vmem>>, vector<256x128xbf16>
    %cst_8 = arith.constant dense<0.000000e+00> : vector<256x128xf32>
    %10 = tpu.matmul %8, %9, %cst_8 {dimension_numbers = #tpu.dot_dimension_numbers<[1], [0], [0], [1], [0, 0, 1, 1], [], []>} : vector<256x256xbf16>, vector<256x128xbf16>, vector<256x128xf32> -> vector<256x128xf32>
    %c0_9 = arith.constant 0 : index
    %c0_10 = arith.constant 0 : index
    %11 = vector.load %arg5[%c0_9, %c0_10] : memref<1x128xf32, #tpu.memory_space<vmem>>, vector<1x128xf32>
    %12 = vector.broadcast %11 : vector<1x128xf32> to vector<256x128xf32>
    %13 = arith.addf %10, %12 : vector<256x128xf32>
    %cst_11 = arith.constant 0.000000e+00 : f32
    %14 = vector.broadcast %cst_11 : f32 to vector<256x128xf32>
    %15 = arith.maximumf %13, %14 : vector<256x128xf32>
    %16 = arith.truncf %15 : vector<256x128xf32> to vector<256x128xbf16>
    %c0_12 = arith.constant 0 : index
    %c0_13 = arith.constant 0 : index
    %17 = vector.load %arg6[%c0_12, %c0_13] : memref<128x128xbf16, #tpu.memory_space<vmem>>, vector<128x128xbf16>
    %cst_14 = arith.constant dense<0.000000e+00> : vector<256x128xf32>
    %18 = tpu.matmul %16, %17, %cst_14 {dimension_numbers = #tpu.dot_dimension_numbers<[1], [0], [0], [1], [0, 0, 1, 1], [], []>} : vector<256x128xbf16>, vector<128x128xbf16>, vector<256x128xf32> -> vector<256x128xf32>
    %c0_15 = arith.constant 0 : index
    %c0_16 = arith.constant 0 : index
    %19 = vector.load %arg7[%c0_15, %c0_16] : memref<1x128xf32, #tpu.memory_space<vmem>>, vector<1x128xf32>
    %20 = vector.broadcast %19 : vector<1x128xf32> to vector<256x128xf32>
    %21 = arith.addf %18, %20 : vector<256x128xf32>
    %c0_17 = arith.constant 0 : index
    %c0_18 = arith.constant 0 : index
    %22 = vector.load %arg8[%c0_17, %c0_18] : memref<256x128xf32, #tpu.memory_space<vmem>>, vector<256x128xf32>
    tpu.vector_store %arg8[%c0_17, %c0_18], %21 {strides = array<i32>} : memref<256x128xf32, #tpu.memory_space<vmem>>, vector<256x128xf32>,
    return
  }
  func.func @transform_0(%arg0: i32) -> (i32, i32) {
    %c0_i32 = arith.constant 0 : i32
    %c0_i32_0 = arith.constant 0 : i32
    return %arg0, %c0_i32 : i32, i32
  }
  func.func @transform_1(%arg0: i32) -> (i32, i32) {
    %c0_i32 = arith.constant 0 : i32
    %c0_i32_0 = arith.constant 0 : i32
    %c0_i32_1 = arith.constant 0 : i32
    return %c0_i32, %c0_i32_0 : i32, i32
  }
  func.func @transform_2(%arg0: i32) -> (i32, i32) {
    %c0_i32 = arith.constant 0 : i32
    %c0_i32_0 = arith.constant 0 : i32
    %c0_i32_1 = arith.constant 0 : i32
    return %c0_i32, %c0_i32_0 : i32, i32
  }
  func.func @transform_3(%arg0: i32) -> (i32, i32) {
    %c0_i32 = arith.constant 0 : i32
    %c0_i32_0 = arith.constant 0 : i32
    %c0_i32_1 = arith.constant 0 : i32
    return %c0_i32, %c0_i32_0 : i32, i32
  }
  func.func @transform_4(%arg0: i32) -> (i32, i32) {
    %c0_i32 = arith.constant 0 : i32
    %c0_i32_0 = arith.constant 0 : i32
    %c0_i32_1 = arith.constant 0 : i32
    return %c0_i32, %c0_i32_0 : i32, i32
  }
  func.func @transform_5(%arg0: i32) -> (i32, i32) {
    %c0_i32 = arith.constant 0 : i32
    %c0_i32_0 = arith.constant 0 : i32
    %c0_i32_1 = arith.constant 0 : i32
    return %c0_i32, %c0_i32_0 : i32, i32
  }
  func.func @transform_6(%arg0: i32) -> (i32, i32) {
    %c0_i32 = arith.constant 0 : i32
    %c0_i32_0 = arith.constant 0 : i32
    %c0_i32_1 = arith.constant 0 : i32
    return %c0_i32, %c0_i32_0 : i32, i32
  }
  func.func @transform_7(%arg0: i32) -> (i32, i32) {
    %c0_i32 = arith.constant 0 : i32
    %c0_i32_0 = arith.constant 0 : i32
    return %arg0, %c0_i32 : i32, i32
  }
}

</mosaic_0001>

<bundles_post_ra>
// kernel: tpu_custom_call.1
= control target key start
LH: loop header
LB: loop body
LE: loop exit
PB: predicated region body
PF: predicated region fallthrough
CT: control target
= control target key end

     0   :  { %s3694_s0 = inlined_call_operand.hbm [shape: bf16[512,512], index: 0, kind: input, shape index: {}]   ;;  %s3695_s1 = inlined_call_operand.hbm [shape: bf16[512,256], index: 1, kind: input, shape index: {}]   ;;  %s3696_s2 = inlined_call_operand.vmem [shape: f32[1,256], index: 2, kind: input, shape index: {}]   ;;  %s3697_s3 = inlined_call_operand.hbm [shape: bf16[256,128], index: 3, kind: input, shape index: {}]   ;;  %s3698_s4 = inlined_call_operand.vmem [shape: f32[1,128], index: 4, kind: input, shape index: {}]   ;;  %s3699_s5 = inlined_call_operand.hbm [shape: bf16[128,128], index: 5, kind: input, shape index: {}]   ;;  %s3700_s6 = inlined_call_operand.vmem [shape: f32[1,128], index: 6, kind: input, shape index: {}]   ;;  %s3701_s7 = inlined_call_operand.hbm [shape: f32[512,128], index: 7, kind: output, shape index: {}]  }
   0x1   :  { %3706 = sst [smem:[#allocation15_spill]] %s3695_s1 }
   0x2   :  { %12 = vsyncpa [#allocation3], 0 }
   0x3   :  { %14 = vsyncpa [#allocation3 + $0x1], 0 }
   0x4   :  { %15 = vsyncpa [#allocation6], 0 }
   0x5   :  { %16 = vsyncpa [#allocation9], 0 }
   0x6   :  { %17 = vsyncpa [#allocation4], 0 }
   0x7   :  { %19 = vsyncpa [#allocation4 + $0x1], 0  ;;  %s3243_s24 = smov 0   ;;  %s3245_s25 = smov 0  }
   0x8   :  { %s3247_s26 = smov 0   ;;  %s3249_s27 = smov 0  }
   0x9 LB: > { %s3264_s28 = sadd.s32 4294967295, %s3188_s27   ;;  %s2331_s29 = sadd.s32 4294967294, %s3188_s27   ;;  %s3188_s27 = sphi %s3249_s27, %s3727_s27   ;;  %s3184_s26 = sphi %s3247_s26, %s3726_s26   ;;  %s3180_s25 = sphi %s3245_s25, %s3725_s25   ;;  %s3176_s24 = sphi %s3243_s24, %s3724_s24  }
   0xa   : > { %p45_p0 = scmp.ne.s32.totalorder %s3180_s25, %s3176_s24  ;;  %p3702_p1 = scmp.eq.s32.totalorder %s3264_s28, 0 }
   0xb   : > { %p201_p3 = scmp.eq.s32.totalorder %s2331_s29, 1  ;;  %p2332_p5 = scmp.ge.s32.totalorder %s3188_s27, 1 }
   0xc   : > { %p3273_p4 = por %p3702_p1, %p45_p0  ;;  %p208_p7 = scmp.lt.s32.totalorder %s3188_s27, 3 }
   0xd   : > { %p3278_p6 = por %p201_p3, %p45_p0  ;;  %s3190_s10 = smov [#allocation5]  }
   0xe   : > { %s3707_s30 = scalar_select %p3273_p4, 1, 0 }
   0xf   : > { %s3708_s8 = scalar_select %p3278_p6, 1, 0 }
  0x10   : > { %p3283_p8 = pnand %p2332_p5, %p208_p7  ;;  %s220_s11 = sshll.u32 %s3190_s10, 4  ;;  %s221_s11 = int_to_ptr.vmem [resolvable:$true] %s220_s11 }
  0x11   : > { %s3191_s13 = smov [#allocation7]   ;;  %s3021_s15 = scalar_lea.vmem %s221_s11, 8192 }
  0x12   : > { %s3709_s9 = scalar_select %p3283_p8, 1, 0 }
  0x13   : > { %p2725_p9 = pneg %p3283_p8  ;;  %s236_s14 = sshll.u32 %s3191_s13, 4  ;;  %s237_s14 = int_to_ptr.vmem [resolvable:$true] %s236_s14 }
  0x14   : > { %p3022_p13 = scmp.ne.s32.totalorder %s221_s11, %s3021_s15  ;;  %p3029_p5 = scmp.lt.s32.totalorder %s221_s11, %s221_s11 }
  0x15   : > { %p3292_p11 = pnand %p2725_p9, %p3702_p1  ;;  %p3030_p7 = scmp.lt.s32.totalorder %s3021_s15, %s3021_s15 }
  0x17   : > { %p3012_p12 = pneg %p3292_p11  ;;  %p3031_p10 = por %p3030_p7, %p3029_p5 }
  0x19   : > { %p3024_p0 = pnand %p3022_p13, %p3012_p12 }
  0x1b   : > { %p3025_p3 = pneg %p3024_p0 }
  0x1d   : > { %p3032_p9 = pnand %p3031_p10, %p3025_p3 }
  0x1f   : > { %3035 = shalt.err (!%p3032_p9)
}
  0x20   : > { %s3192_s16 = smov 128   ;;  %s3193_s17 = smov 8  }
  0x21   : > { %s3711_s1 = sld [smem:[#allocation15_spill]]  ;;  %s3047_s20 = scalar_lea.vmem %s237_s14, 2048 }
  0x22   : > { %p3048_p1 = scmp.ne.s32.totalorder %s237_s14, %s3047_s20  ;;  %p3055_p2 = scmp.lt.s32.totalorder %s237_s14, %s237_s14 }
  0x23   : > { %p3056_p6 = scmp.lt.s32.totalorder %s3047_s20, %s3047_s20 }
  0x24   : > { %p3050_p13 = pnand %p3048_p1, %p3012_p12 }
  0x25   : > { %p3057_p5 = por %p3056_p6, %p3055_p2 }
  0x26   : > { %p3051_p0 = pneg %p3050_p13 }
  0x27   : > { %2728 = dma.hbm_to_vmem [thread:$0]  (!%p3292_p11), %s3711_s1, 8192, %s221_s11, [#allocation6], %s3192_s16, %s3192_s16, %s3193_s17  }
  0x28   : > { %p3058_p10 = pnand %p3057_p5, %p3051_p0 }
  0x2a   : > { %3061 = shalt.err (!%p3058_p10)
}
  0x2b   : > { %s3194_s21 = smov 64   ;;  %s3195_s22 = smov 4  }
  0x2c   : > { %2731 = dma.hbm_to_vmem [thread:$0]  (!%p3292_p11), %s3697_s3, 2048, %s237_s14, [#allocation6], %s3194_s21, %s3194_s21, %s3195_s22  }
  0x2d   : > { %s3196_s10 = smov [#allocation8]   ;;  %s3315_s13 = sadd.s32 1, %s3188_s27  }
  0x2e   : > { %s252_s11 = sshll.u32 %s3196_s10, 4  ;;  %s253_s11 = int_to_ptr.vmem [resolvable:$true] %s252_s11 }
  0x2f   : > { %s3073_s15 = scalar_lea.vmem %s253_s11, 1024  ;;  %p3081_p3 = scmp.lt.s32.totalorder %s253_s11, %s253_s11 }
  0x30   : > { %p3074_p1 = scmp.ne.s32.totalorder %s253_s11, %s3073_s15  ;;  %p3082_p7 = scmp.lt.s32.totalorder %s3073_s15, %s3073_s15 }
  0x32   : > { %p3076_p2 = pnand %p3074_p1, %p3012_p12  ;;  %p3083_p9 = por %p3082_p7, %p3081_p3 }
  0x34   : > { %p3077_p6 = pneg %p3076_p2 }
  0x36   : > { %p3084_p13 = pnand %p3083_p9, %p3077_p6 }
  0x38   : > { %3087 = shalt.err (!%p3084_p13)
}
  0x39   : > { %2734 = dma.hbm_to_vmem [thread:$0]  (!%p3292_p11), %s3699_s5, 1024, %s253_s11, [#allocation9], %s3194_s21, %s3194_s21, %s3195_s22  }
  0x3a   : > { %s29_s17 = ssub.s32 %s3188_s27, %s3315_s13  ;;  %s32_s18 = sadd.s32 1, %s3184_s26 }
  0x3b   : > { %p30_p12 = scmp.eq.s32.totalorder %s29_s17, 0  ;;  %p39_p0 = scmp.ne.s32.totalorder %s3184_s26, %s3180_s25 }
  0x3c   : > { %p40_p5 = scmp.eq.s32.totalorder %s3188_s27, 0  ;;  %p2746_p10 = scmp.lt.s32.totalorder %s3188_s27, 2 }
  0x3d   : > { %s3333_s12 = scalar_select %p30_p12, %s3184_s26, %s32_s18  }
  0x3e   : > { %p41_p1 = por %p40_p5, %p39_p0  ;;  %p3712_p2 = scmp.eq.s32.totalorder %s3264_s28, 1 }
  0x3f   : > { %s269_s20 = sand.u32 1, %s3184_s26   ;;  %s2507_s23 = sshll.u32 %s3188_s27, 13 }
  0x40   : > { %p3337_p6 = por %p3712_p2, %p39_p0  ;;  %s2337_s29 = sshll.u32 %s269_s20, 9 }
  0x41   : > { %s3346_s21 = scalar_lea.hbm %s3694_s0, %s2507_s23  ;;  %s273_s22 = scalar_lea.vmem [#allocation2], %s2337_s29 }
  0x42   : > { %s3713_s19 = scalar_select %p3337_p6, 1, 0 }
  0x43   : > { %s281_s11 = sshll.u32 %s273_s22, 4  ;;  %p3348_p11 = pnand %p2746_p10, %p41_p1  ;;  %s3352_s11 = int_to_ptr.vmem [resolvable:$true] %s281_s11 }
  0x44   : > { %s3354_s14 = scalar_lea.sflag [#allocation3], %s269_s20  ;;  %s3088_s17 = scalar_lea.hbm %s3346_s21, 8192 }
  0x45   : > { %p3089_p3 = scmp.ne.s32.totalorder %s3346_s21, %s3088_s17  ;;  %p3090_p7 = pneg %p3348_p11 }
  0x46   : > { %s3093_s29 = scalar_lea.hbm %s3694_s0, 16384  ;;  %p3094_p12 = scmp.lt.s32.totalorder %s3346_s21, %s3694_s0 }
  0x47   : > { %p3091_p9 = pnand %p3090_p7, %p3089_p3  ;;  %p3095_p0 = scmp.lt.s32.totalorder %s3093_s29, %s3088_s17 }
  0x49   : > { %p3092_p13 = pneg %p3091_p9  ;;  %p3096_p5 = por %p3095_p0, %p3094_p12 }
  0x4b   : > { %p3097_p10 = pnand %p3096_p5, %p3092_p13 }
  0x4d   : > { %3100 = shalt.err (!%p3097_p10)
}
  0x4e   : > { %s3101_s20 = scalar_lea.vmem %s3352_s11, 8192  ;;  %s3197_s22 = smov [#allocation2]  }
  0x4f   : > { %p3102_p1 = scmp.ne.s32.totalorder %s3352_s11, %s3101_s20  ;;  %s3106_s1 = sshll.u32 %s3197_s22, 4  ;;  %s3107_s1 = int_to_ptr.vmem [resolvable:$false] %s3106_s1 }
  0x50   : > { %s3108_s18 = scalar_lea.vmem %s3107_s1, 16384  ;;  %p3109_p9 = scmp.lt.s32.totalorder %s3352_s11, %s3107_s1 }
  0x51   : > { %p3104_p2 = pnand %p3102_p1, %p3090_p7  ;;  %p3110_p6 = scmp.lt.s32.totalorder %s3108_s18, %s3101_s20 }
  0x53   : > { %p3105_p3 = pneg %p3104_p2  ;;  %p3111_p4 = por %p3110_p6, %p3109_p9 }
  0x55   : > { %p3112_p8 = pnand %p3111_p4, %p3105_p3 }
  0x57   : > { %3115 = shalt.err (!%p3112_p8)
}
  0x58   : > { %s3198_s17 = smov 256   ;;  %s3199_s23 = smov 16  }
  0x59   : > { %2738 = dma.hbm_to_vmem [thread:$0]  (!%p3348_p11), %s3346_s21, 8192, %s3352_s11, %s3354_s14, %s3198_s17, %s3198_s17, %s3199_s23  }
  0x5a   : > { %p3715_p7 = scmp.ne.s32.totalorder %s3709_s9, 0 }
  0x5b   : > { %s3378_s29 = sand.u32 (!%p3715_p7), 1, %s3180_s25   ;;  %p3716_p4 = scmp.ne.s32.totalorder (!%p3715_p7), %s3707_s30, 0 }
  0x5c   : > { %293 = sbr.rel (%p3715_p7) target bundleno = 920 (0x398), region = 48  ;;  %s2342_s1 = sshll.u32 (!%p3715_p7), %s3378_s29, 9 }
  0x5d   : > { %s296_s10 = scalar_lea.sflag (!%p3715_p7), [#allocation3], %s3378_s29  ;;  %s3382_s15 = scalar_lea.vmem (!%p3715_p7), [#allocation2], %s2342_s1 }
  0x61   : > { %3159 = dma.done.wait (%p3716_p4), %s296_s10, 8192  }
  0x62   : > { %3161 = vsyncadd (%p3716_p4), %s296_s10, 4294959104  ;;  %p3717_p8 = scmp.eq.s32.totalorder %s3264_s28, 0 }
  0x64   : > { %3163 = dma.done.wait (%p3717_p8), [#allocation6], 10240   ;;  %p3718_p6 = pmov %p3717_p8 }
  0x66   : > { %3165 = vsyncadd (%p3718_p6), [#allocation6], 4294957056  ;;  %p3719_p11 = pmov %p3718_p6 }
  0x67   : > { %p3720_p13 = pmov %p3718_p6 }
  0x68   : > { %3167 = dma.done.wait (%p3719_p11), [#allocation9], 1024  }
  0x69   : > { %3169 = vsyncadd (%p3720_p13), [#allocation9], 4294966272  ;;  %v2794_v0 = vld [vmem:[#allocation5 + $0x74] ss:$8 sps:$4 sm:$0xff]   ;;  %v2798_v2 = vld [vmem:[#allocation5 + $0x70] ss:$8 sps:$4 sm:$0xff]  }
  0x6a   : > { %v2796_v1 = vld [vmem:[#allocation5 + $0x174] ss:$8 sps:$4 sm:$0xff]   ;;  %1125 = vmatprep.subr.bf16.mxu0 %v2794_v0  ;;  %v2799_v3 = vld [vmem:[#allocation5 + $0x170] ss:$8 sps:$4 sm:$0xff]   ;;  %v2800_v4 = vld [vmem:[#allocation5 + $0x64] ss:$8 sps:$4 sm:$0xff]  }
  0x6b   : > { %1318 = vmatprep.subr.bf16.mxu1 %v2796_v1  ;;  %1126 = vmatpush1.bf16.msra.mxu0 %v2798_v2  ;;  %v2802_v5 = vld [vmem:[#allocation5 + $0x164] ss:$8 sps:$4 sm:$0xff]   ;;  %v2804_v6 = vld [vmem:[#allocation5 + $0x60] ss:$8 sps:$4 sm:$0xff]   ;;  %v2806_v8 = vld [vmem:[#allocation5 + $0x54] ss:$8 sps:$4 sm:$0xff]  }
  0x6c   : > { %1319 = vmatpush1.bf16.msra.mxu1 %v2799_v3  ;;  %1127 = vmatprep.subr.bf16.mxu0 %v2800_v4  ;;  %v2805_v7 = vld [vmem:[#allocation5 + $0x160] ss:$8 sps:$4 sm:$0xff]   ;;  %v2808_v9 = vld [vmem:[#allocation5 + $0x154] ss:$8 sps:$4 sm:$0xff]   ;;  %v2810_v10 = vld [vmem:[#allocation5 + $0x50] ss:$8 sps:$4 sm:$0xff]  }
  0x6d   : > { %1320 = vmatprep.subr.bf16.mxu1 %v2802_v5  ;;  %v2811_v11 = vld [vmem:[#allocation5 + $0x150] ss:$8 sps:$4 sm:$0xff]   ;;  %v2812_v12 = vld [vmem:[#allocation5 + $0x44] ss:$8 sps:$4 sm:$0xff]   ;;  %v2816_v14 = vld [vmem:[#allocation5 + $0x40] ss:$8 sps:$4 sm:$0xff]  }
  0x6e   : > { %v2814_v13 = vld [vmem:[#allocation5 + $0x144] ss:$8 sps:$4 sm:$0xff]   ;;  %v2817_v15 = vld [vmem:[#allocation5 + $0x140] ss:$8 sps:$4 sm:$0xff]   ;;  %v2818_v16 = vld [vmem:[#allocation5 + $0x34] ss:$8 sps:$4 sm:$0xff]  }
  0x6f   : > { %1128 = vmatpush1.bf16.msra.mxu0 %v2804_v6  ;;  %v2820_v17 = vld [vmem:[#allocation5 + $0x134] ss:$8 sps:$4 sm:$0xff]   ;;  %v2822_v18 = vld [vmem:[#allocation5 + $0x30] ss:$8 sps:$4 sm:$0xff]   ;;  %v2824_v20 = vld [vmem:[#allocation5 + $0x24] ss:$8 sps:$4 sm:$0xff]  }
  0x70   : > { %1321 = vmatpush1.bf16.msra.mxu1 %v2805_v7  ;;  %1129 = vmatprep.subr.bf16.mxu0 %v2806_v8  ;;  %v2823_v19 = vld [vmem:[#allocation5 + $0x130] ss:$8 sps:$4 sm:$0xff]   ;;  %v2826_v21 = vld [vmem:[#allocation5 + $0x124] ss:$8 sps:$4 sm:$0xff]   ;;  %v2828_v22 = vld [vmem:[#allocation5 + $0x20] ss:$8 sps:$4 sm:$0xff]  }
  0x71   : > { %1322 = vmatprep.subr.bf16.mxu1 %v2808_v9  ;;  %v2829_v23 = vld [vmem:[#allocation5 + $0x120] ss:$8 sps:$4 sm:$0xff]   ;;  %v2830_v24 = vld [vmem:[#allocation5 + $0x14] ss:$8 sps:$4 sm:$0xff]   ;;  %v2834_v26 = vld [vmem:[#allocation5 + $0x10] ss:$8 sps:$4 sm:$0xff]  }
  0x72   : > { %v2832_v25 = vld [vmem:[#allocation5 + $0x114] ss:$8 sps:$4 sm:$0xff]   ;;  %v2835_v27 = vld [vmem:[#allocation5 + $0x110] ss:$8 sps:$4 sm:$0xff]   ;;  %v2836_v28 = vld [vmem:[#allocation5 + $0x4] ss:$8 sps:$4 sm:$0xff]  }
  0x73   : > { %1130 = vmatpush1.bf16.msra.mxu0 %v2810_v10  ;;  %v2838_v29 = vld [vmem:[#allocation5 + $0x104] ss:$8 sps:$4 sm:$0xff]   ;;  %v2840_v30 = vld [vmem:[#allocation5] ss:$8 sps:$4 sm:$0xff]   ;;  %v2842_v32 = vld [vmem:[#allocation5 + $0xf4] ss:$8 sps:$4 sm:$0xff]  }
  0x74   : > { %1323 = vmatpush1.bf16.msra.mxu1 %v2811_v11  ;;  %1131 = vmatprep.subr.bf16.mxu0 %v2812_v12  ;;  %v2841_v31 = vld [vmem:[#allocation5 + $0x100] ss:$8 sps:$4 sm:$0xff]   ;;  %v2844_v33 = vld [vmem:[#allocation5 + $0x1f4] ss:$8 sps:$4 sm:$0xff]   ;;  %v2846_v34 = vld [vmem:[#allocation5 + $0xf0] ss:$8 sps:$4 sm:$0xff]  }
  0x75   : > { %1324 = vmatprep.subr.bf16.mxu1 %v2814_v13  ;;  %v2847_v35 = vld [vmem:[#allocation5 + $0x1f0] ss:$8 sps:$4 sm:$0xff]   ;;  %v2848_v36 = vld [vmem:[#allocation5 + $0xe4] ss:$8 sps:$4 sm:$0xff]   ;;  %v2852_v38 = vld [vmem:[#allocation5 + $0xe0] ss:$8 sps:$4 sm:$0xff]  }
  0x76   : > { %v2850_v37 = vld [vmem:[#allocation5 + $0x1e4] ss:$8 sps:$4 sm:$0xff]   ;;  %v2853_v39 = vld [vmem:[#allocation5 + $0x1e0] ss:$8 sps:$4 sm:$0xff]   ;;  %v2854_v40 = vld [vmem:[#allocation5 + $0xd4] ss:$8 sps:$4 sm:$0xff]  }
  0x77   : > { %1132 = vmatpush1.bf16.msra.mxu0 %v2816_v14  ;;  %v2856_v41 = vld [vmem:[#allocation5 + $0x1d4] ss:$8 sps:$4 sm:$0xff]   ;;  %v2858_v42 = vld [vmem:[#allocation5 + $0xd0] ss:$8 sps:$4 sm:$0xff]   ;;  %v2860_v44 = vld [vmem:[#allocation5 + $0xc4] ss:$8 sps:$4 sm:$0xff]  }
  0x78   : > { %1325 = vmatpush1.bf16.msra.mxu1 %v2817_v15  ;;  %1133 = vmatprep.subr.bf16.mxu0 %v2818_v16  ;;  %v2859_v43 = vld [vmem:[#allocation5 + $0x1d0] ss:$8 sps:$4 sm:$0xff]   ;;  %v2862_v45 = vld [vmem:[#allocation5 + $0x1c4] ss:$8 sps:$4 sm:$0xff]   ;;  %v2864_v46 = vld [vmem:[#allocation5 + $0xc0] ss:$8 sps:$4 sm:$0xff]  }
  0x79   : > { %1326 = vmatprep.subr.bf16.mxu1 %v2820_v17  ;;  %v2865_v47 = vld [vmem:[#allocation5 + $0x1c0] ss:$8 sps:$4 sm:$0xff]   ;;  %v2866_v48 = vld [vmem:[#allocation5 + $0xb4] ss:$8 sps:$4 sm:$0xff]   ;;  %v2870_v52 = vld [vmem:[#allocation5 + $0xb0] ss:$8 sps:$4 sm:$0xff]  }
  0x7a   : > { %v2892_v49 = vld [vmem:[%s3382_s15 + $0x4] ss:$16 sps:$4 sm:$0xff]   ;;  %v2895_v51 = vld [vmem:[%s3382_s15 + $0xc] ss:$16 sps:$4 sm:$0xff]   ;;  %v2871_v53 = vld [vmem:[#allocation5 + $0x1b0] ss:$8 sps:$4 sm:$0xff]  }
  0x7b   : > { %1134 = vmatpush1.bf16.msra.mxu0 %v2822_v18  ;;  %v2868_v50 = vld [vmem:[#allocation5 + $0x1b4] ss:$8 sps:$4 sm:$0xff]   ;;  %1157 = vmatprep.mubr.bf16.mxu0 %v2892_v49  ;;  %v2872_v54 = vld [vmem:[#allocation5 + $0xa4] ss:$8 sps:$4 sm:$0xff]   ;;  %v2876_v56 = vld [vmem:[#allocation5 + $0xa0] ss:$8 sps:$4 sm:$0xff]  }
  0x7c   : > { %1327 = vmatpush1.bf16.msra.mxu1 %v2823_v19  ;;  %1135 = vmatprep.subr.bf16.mxu0 %v2824_v20  ;;  %v2874_v55 = vld [vmem:[#allocation5 + $0x1a4] ss:$8 sps:$4 sm:$0xff]   ;;  %v2877_v57 = vld [vmem:[#allocation5 + $0x1a0] ss:$8 sps:$4 sm:$0xff]   ;;  %v2878_v58 = vld [vmem:[#allocation5 + $0x94] ss:$8 sps:$4 sm:$0xff]  }
  0x7d   : > { %1328 = vmatprep.subr.bf16.mxu1 %v2826_v21  ;;  %1350 = vmatprep.mubr.bf16.mxu1 %v2895_v51  ;;  %v2880_v59 = vld [vmem:[#allocation5 + $0x194] ss:$8 sps:$4 sm:$0xff]   ;;  %v2882_v60 = vld [vmem:[#allocation5 + $0x90] ss:$8 sps:$4 sm:$0xff]   ;;  %v2884_v62 = vld [vmem:[#allocation5 + $0x84] ss:$8 sps:$4 sm:$0xff]  }
  0x7e   : > { %v2883_v61 = vld [vmem:[#allocation5 + $0x190] ss:$8 sps:$4 sm:$0xff]   ;;  %v2886_v63 = vld [vmem:[#allocation5 + $0x184] ss:$8 sps:$4 sm:$0xff]   ;;  %v2888_v0 = vld [vmem:[#allocation5 + $0x80] ss:$8 sps:$4 sm:$0xff]  }
  0x7f   : > { %1136 = vmatpush1.bf16.msra.mxu0 %v2828_v22  ;;  %v2889_v1 = vld [vmem:[#allocation5 + $0x180] ss:$8 sps:$4 sm:$0xff]   ;;  %v2896_v4 = vld [vmem:[%s3382_s15 + $0x24] ss:$16 sps:$4 sm:$0xff]   ;;  %v2898_v5 = vld [vmem:[%s3382_s15 + $0x2c] ss:$16 sps:$4 sm:$0xff]  }
  0x80   : > { %1329 = vmatpush1.bf16.msra.mxu1 %v2829_v23  ;;  %1137 = vmatprep.subr.bf16.mxu0 %v2830_v24  ;;  %v2890_v2 = vld [vmem:[%s3382_s15] ss:$16 sps:$4 sm:$0xff]   ;;  %v2893_v3 = vld [vmem:[%s3382_s15 + $0x8] ss:$16 sps:$4 sm:$0xff]   ;;  %v2902_v8 = vld [vmem:[%s3382_s15 + $0x44] ss:$16 sps:$4 sm:$0xff]  }
  0x81   : > { %1330 = vmatprep.subr.bf16.mxu1 %v2832_v25  ;;  %v2900_v6 = vld [vmem:[%s3382_s15 + $0x20] ss:$16 sps:$4 sm:$0xff]   ;;  %v2901_v7 = vld [vmem:[%s3382_s15 + $0x28] ss:$16 sps:$4 sm:$0xff]   ;;  %v2904_v9 = vld [vmem:[%s3382_s15 + $0x4c] ss:$16 sps:$4 sm:$0xff]  }
  0x82   : > { %v2906_v10 = vld [vmem:[%s3382_s15 + $0x40] ss:$16 sps:$4 sm:$0xff]   ;;  %v2907_v11 = vld [vmem:[%s3382_s15 + $0x48] ss:$16 sps:$4 sm:$0xff]   ;;  %v2908_v13 = vld [vmem:[%s3382_s15 + $0x64] ss:$16 sps:$4 sm:$0xff]  }
  0x83   : > { %1138 = vmatpush1.bf16.msra.mxu0 %v2834_v26  ;;  %v2966_v12 = vld [vmem:[#allocation7 + $0x78] sm:$0xff]   ;;  %v2980_v16 = vld [vmem:[#allocation7 + $0x70] sm:$0xff]   ;;  %v2990_v22 = vld [vmem:[#allocation7 + $0x68] sm:$0xff]   ;;  %s2346_s16 = sshll.u32 %s3378_s29, 8  ;;  %s2508_s18 = sshll.u32 %s3264_s28, 12 }
  0x84   : > { %1331 = vmatpush1.bf16.msra.mxu1 %v2835_v27  ;;  %1139 = vmatprep.subr.bf16.mxu0 %v2836_v28  ;;  %v2969_v14 = vld [vmem:[#allocation7 + $0x38] sm:$0xff]   ;;  %v2912_v17 = vld [vmem:[%s3382_s15 + $0x60] ss:$16 sps:$4 sm:$0xff]   ;;  %v2914_v20 = vld [vmem:[%s3382_s15 + $0x84] ss:$16 sps:$4 sm:$0xff]   ;;  %s3579_s22 = scalar_lea.vmem [#allocation10], %s2346_s16  ;;  %s3646_s10 = scalar_lea.hbm %s3701_s7, %s2508_s18 }
  0x85   : > { %1332 = vmatprep.subr.bf16.mxu1 %v2838_v29  ;;  %v2910_v15 = vld [vmem:[%s3382_s15 + $0x6c] ss:$16 sps:$4 sm:$0xff]   ;;  %v2983_v18 = vld [vmem:[#allocation7 + $0x30] sm:$0xff]   ;;  %v2913_v19 = vld [vmem:[%s3382_s15 + $0x68] ss:$16 sps:$4 sm:$0xff]   ;;  %s2229_s17 = sshll.u32 %s3579_s22, 4  ;;  %s3648_s17 = int_to_ptr.vmem [resolvable:$true] %s2229_s17 }
  0x86   : > { %v2916_v21 = vld [vmem:[%s3382_s15 + $0x8c] ss:$16 sps:$4 sm:$0xff]   ;;  %v2992_v24 = vld [vmem:[#allocation7 + $0x60] sm:$0xff]   ;;  %v2919_v26 = vld [vmem:[%s3382_s15 + $0x88] ss:$16 sps:$4 sm:$0xff]   ;;  %s2216_s28 = scalar_lea.sflag [#allocation4], %s3378_s29 }
  0x87   : > { %1140 = vmatpush1.bf16.msra.mxu0 %v2840_v30  ;;  %v2991_v23 = vld [vmem:[#allocation7 + $0x28] sm:$0xff]   ;;  %v2918_v25 = vld [vmem:[%s3382_s15 + $0x80] ss:$16 sps:$4 sm:$0xff]   ;;  %v2920_v28 = vld [vmem:[%s3382_s15 + $0xa4] ss:$16 sps:$4 sm:$0xff]   ;;  %p3721_p0 = scmp.ne.s32.totalorder %s3713_s19, 0 }
  0x88   : > { %1333 = vmatpush1.bf16.msra.mxu1 %v2841_v31  ;;  %1141 = vmatprep.subr.bf16.mxu0 %v2842_v32  ;;  %v2993_v27 = vld [vmem:[#allocation7 + $0x20] sm:$0xff]   ;;  %v2922_v29 = vld [vmem:[%s3382_s15 + $0xac] ss:$16 sps:$4 sm:$0xff]   ;;  %v2996_v32 = vld [vmem:[#allocation7 + $0x50] sm:$0xff]   ;;  %s3200_s30 = smov [#allocation10]  }
  0x89   : > { %1334 = vmatprep.subr.bf16.mxu1 %v2844_v33  ;;  %v2994_v30 = vld [vmem:[#allocation7 + $0x58] sm:$0xff]   ;;  %v2997_v33 = vld [vmem:[#allocation7 + $0x10] sm:$0xff]   ;;  %s3120_s9 = sshll.u32 %s3200_s30, 4  ;;  %s3121_s9 = int_to_ptr.vmem [resolvable:$false] %s3120_s9 }
  0x8a   : > { %v2995_v31 = vld [vmem:[#allocation7 + $0x18] sm:$0xff]   ;;  %v2944_v49 = vld [vmem:[%s3382_s15 + $0x124] ss:$16 sps:$4 sm:$0xff]   ;;  %v2948_v51 = vld [vmem:[%s3382_s15 + $0x120] ss:$16 sps:$4 sm:$0xff]   ;;  %s3122_s21 = scalar_lea.vmem %s3121_s9, 8192  ;;  %p3123_p1 = scmp.lt.s32.totalorder %s3648_s17, %s3121_s9 }
  0x8b   : > { %1142 = vmatpush2.bf16.msra.mxu0 %v2846_v34  ;;  %v2924_v34 = vld [vmem:[%s3382_s15 + $0xa0] ss:$16 sps:$4 sm:$0xff]  }
  0x8c   : > { %1335 = vmatpush2.bf16.msra.mxu1 %v2847_v35  ;;  %1143 = vmatprep.subr.bf16.mxu0 %v2848_v36  ;;  %v2925_v35 = vld [vmem:[%s3382_s15 + $0xa8] ss:$16 sps:$4 sm:$0xff]   ;;  %v2926_v36 = vld [vmem:[%s3382_s15 + $0xc4] ss:$16 sps:$4 sm:$0xff]  }
  0x8d   : > { %1336 = vmatprep.subr.bf16.mxu1 %v2850_v37  ;;  %v2928_v37 = vld [vmem:[%s3382_s15 + $0xcc] ss:$16 sps:$4 sm:$0xff]  }
  0x8f   : > { %1144 = vmatpush2.bf16.msra.mxu0 %v2852_v38  ;;  %v2998_v38 = vld [vmem:[#allocation7 + $0x48] sm:$0xff]  }
  0x90   : > { %1337 = vmatpush2.bf16.msra.mxu1 %v2853_v39  ;;  %1145 = vmatprep.subr.bf16.mxu0 %v2854_v40  ;;  %v2930_v39 = vld [vmem:[%s3382_s15 + $0xc0] ss:$16 sps:$4 sm:$0xff]   ;;  %v2931_v40 = vld [vmem:[%s3382_s15 + $0xc8] ss:$16 sps:$4 sm:$0xff]  }
  0x91   : > { %1338 = vmatprep.subr.bf16.mxu1 %v2856_v41  ;;  %v2932_v41 = vld [vmem:[%s3382_s15 + $0xe4] ss:$16 sps:$4 sm:$0xff]  }
  0x93   : > { %1146 = vmatpush2.bf16.msra.mxu0 %v2858_v42  ;;  %v2934_v42 = vld [vmem:[%s3382_s15 + $0xec] ss:$16 sps:$4 sm:$0xff]  }
  0x94   : > { %1339 = vmatpush2.bf16.msra.mxu1 %v2859_v43  ;;  %1147 = vmatprep.subr.bf16.mxu0 %v2860_v44  ;;  %v2936_v43 = vld [vmem:[%s3382_s15 + $0xe0] ss:$16 sps:$4 sm:$0xff]   ;;  %v2937_v44 = vld [vmem:[%s3382_s15 + $0xe8] ss:$16 sps:$4 sm:$0xff]  }
  0x95   : > { %1340 = vmatprep.subr.bf16.mxu1 %v2862_v45  ;;  %v2938_v45 = vld [vmem:[%s3382_s15 + $0x104] ss:$16 sps:$4 sm:$0xff]  }
  0x97   : > { %1148 = vmatpush2.bf16.msra.mxu0 %v2864_v46  ;;  %v2940_v46 = vld [vmem:[%s3382_s15 + $0x10c] ss:$16 sps:$4 sm:$0xff]  }
  0x98   : > { %1341 = vmatpush2.bf16.msra.mxu1 %v2865_v47  ;;  %1149 = vmatprep.subr.bf16.mxu0 %v2866_v48  ;;  %v2942_v47 = vld [vmem:[%s3382_s15 + $0x100] ss:$16 sps:$4 sm:$0xff]   ;;  %v2943_v48 = vld [vmem:[%s3382_s15 + $0x108] ss:$16 sps:$4 sm:$0xff]  }
  0x99   : > { %1342 = vmatprep.subr.bf16.mxu1 %v2868_v50  ;;  %v2946_v50 = vld [vmem:[%s3382_s15 + $0x12c] ss:$16 sps:$4 sm:$0xff]  }
  0x9b   : > { %1150 = vmatpush2.bf16.msra.mxu0 %v2870_v52  ;;  %v2949_v52 = vld [vmem:[%s3382_s15 + $0x128] ss:$16 sps:$4 sm:$0xff]  }
  0x9c   : > { %1343 = vmatpush2.bf16.msra.mxu1 %v2871_v53  ;;  %1151 = vmatprep.subr.bf16.mxu0 %v2872_v54  ;;  %v2950_v53 = vld [vmem:[%s3382_s15 + $0x144] ss:$16 sps:$4 sm:$0xff]   ;;  %v2952_v54 = vld [vmem:[%s3382_s15 + $0x14c] ss:$16 sps:$4 sm:$0xff]  }
  0x9d   : > { %1344 = vmatprep.subr.bf16.mxu1 %v2874_v55  ;;  %v2999_v55 = vld [vmem:[#allocation7 + $0x8] sm:$0xff]  }
  0x9f   : > { %1152 = vmatpush2.bf16.msra.mxu0 %v2876_v56  ;;  %v3000_v56 = vld [vmem:[#allocation7 + $0x40] sm:$0xff]  }
  0xa0   : > { %1345 = vmatpush2.bf16.msra.mxu1 %v2877_v57  ;;  %1153 = vmatprep.subr.bf16.mxu0 %v2878_v58  ;;  %v3001_v57 = vld [vmem:[#allocation7] sm:$0xff]  }
  0xa1   : > { %1346 = vmatprep.subr.bf16.mxu1 %v2880_v59  ;;  %v2954_v58 = vld [vmem:[%s3382_s15 + $0x140] ss:$16 sps:$4 sm:$0xff]   ;;  %v2955_v59 = vld [vmem:[%s3382_s15 + $0x148] ss:$16 sps:$4 sm:$0xff]  }
  0xa3   : > { %1154 = vmatpush2.bf16.msra.mxu0 %v2882_v60  ;;  %v2956_v60 = vld [vmem:[%s3382_s15 + $0x164] ss:$16 sps:$4 sm:$0xff]  }
  0xa4   : > { %1347 = vmatpush2.bf16.msra.mxu1 %v2883_v61  ;;  %1155 = vmatprep.subr.bf16.mxu0 %v2884_v62  ;;  %v2958_v61 = vld [vmem:[%s3382_s15 + $0x16c] ss:$16 sps:$4 sm:$0xff]   ;;  %v2960_v62 = vld [vmem:[%s3382_s15 + $0x160] ss:$16 sps:$4 sm:$0xff]  }
  0xa5   : > { %1348 = vmatprep.subr.bf16.mxu1 %v2886_v63  ;;  %v2961_v63 = vld [vmem:[%s3382_s15 + $0x168] ss:$16 sps:$4 sm:$0xff]  }
  0xa7   : > { %1156 = vmatpush2.bf16.msra.mxu0 %v2888_v0  ;;  %v2962_v0 = vld [vmem:[%s3382_s15 + $0x184] ss:$16 sps:$4 sm:$0xff]  }
  0xa8   : > { %1349 = vmatpush2.bf16.msra.mxu1 %v2889_v1  ;;  %2509 = vmatprep.subr.bf16.mxu0 %v2966_v12  ;;  %v2964_v1 = vld [vmem:[%s3382_s15 + $0x18c] ss:$16 sps:$4 sm:$0xff]  }
  0xa9   : > { %2693 = vmatprep.subr.bf16.mxu1 %v2966_v12  ;;  %v2984_v12 = vld [vmem:[%s3382_s15 + $0x1e4] ss:$16 sps:$4 sm:$0xff]  }
  0xaa   : > { %1158 = vmatmul.mubr.bf16.vlgmr.msra.gmra.mxu0 %v2890_v2  ;;  %v2967_v2 = vld [vmem:[%s3382_s15 + $0x180] ss:$16 sps:$4 sm:$0xff]  }
  0xab   : > { %1351 = vmatmul.mubr.bf16.vlgmr.msra.gmra.mxu1 %v2893_v3  ;;  %1167 = vmatprep.mubr.bf16.mxu0 %v2896_v4  ;;  %v2968_v3 = vld [vmem:[%s3382_s15 + $0x188] ss:$16 sps:$4 sm:$0xff]   ;;  %v2970_v4 = vld [vmem:[%s3382_s15 + $0x1a4] ss:$16 sps:$4 sm:$0xff]  }
  0xac   : > { %1360 = vmatprep.mubr.bf16.mxu1 %v2898_v5  ;;  %2510 = vmatpush3.bf16.msra.mxu0 %v2969_v14  ;;  %v2972_v5 = vld [vmem:[%s3382_s15 + $0x1ac] ss:$16 sps:$4 sm:$0xff]  }
  0xad   : > { %2701 = vmatpush3.bf16.msra.mxu1 %v2969_v14  ;;  %2511 = vmatprep.subr.bf16.mxu0 %v2980_v16  ;;  %v2988_v14 = vld [vmem:[%s3382_s15 + $0x1e0] ss:$16 sps:$4 sm:$0xff]  }
  0xae   : > { %2694 = vmatprep.subr.bf16.mxu1 %v2980_v16  ;;  %v475_v16 = vlaneseq }
  0xb0   : > { %2512 = vmatpush3.bf16.msra.mxu0 %v2983_v18 }
  0xb1   : > { %2702 = vmatpush3.bf16.msra.mxu1 %v2983_v18  ;;  %2513 = vmatprep.subr.bf16.mxu0 %v2990_v22 }
  0xb2   : > { %1168 = vmatmul.mubr.bf16.gmra.mxu0 %v2900_v6  ;;  %2695 = vmatprep.subr.bf16.mxu1 %v2990_v22  ;;  %v2974_v6 = vld [vmem:[%s3382_s15 + $0x1a0] ss:$16 sps:$4 sm:$0xff]  }
  0xb3   : > { %1361 = vmatmul.mubr.bf16.gmra.mxu1 %v2901_v7  ;;  %1177 = vmatprep.mubr.bf16.mxu0 %v2902_v8  ;;  %v2975_v7 = vld [vmem:[%s3382_s15 + $0x1a8] ss:$16 sps:$4 sm:$0xff]   ;;  %v2976_v8 = vld [vmem:[%s3382_s15 + $0x1c4] ss:$16 sps:$4 sm:$0xff]  }
  0xb4   : > { %1370 = vmatprep.mubr.bf16.mxu1 %v2904_v9  ;;  %2514 = vmatpush3.bf16.msra.mxu0 %v2991_v23  ;;  %v2978_v9 = vld [vmem:[%s3382_s15 + $0x1cc] ss:$16 sps:$4 sm:$0xff]  }
  0xb5   : > { %2703 = vmatpush3.bf16.msra.mxu1 %v2991_v23  ;;  %2515 = vmatprep.subr.bf16.mxu0 %v2992_v24 }
  0xb6   : > { %2696 = vmatprep.subr.bf16.mxu1 %v2992_v24 }
  0xb8   : > { %2516 = vmatpush3.bf16.msra.mxu0 %v2993_v27 }
  0xb9   : > { %2704 = vmatpush3.bf16.msra.mxu1 %v2993_v27  ;;  %2517 = vmatprep.subr.bf16.mxu0 %v2994_v30 }
  0xba   : > { %1178 = vmatmul.mubr.bf16.gmra.mxu0 %v2906_v10  ;;  %2697 = vmatprep.subr.bf16.mxu1 %v2994_v30  ;;  %v2981_v10 = vld [vmem:[%s3382_s15 + $0x1c0] ss:$16 sps:$4 sm:$0xff]  }
  0xbb   : > { %1371 = vmatmul.mubr.bf16.gmra.mxu1 %v2907_v11  ;;  %1187 = vmatprep.mubr.bf16.mxu0 %v2908_v13  ;;  %v2982_v11 = vld [vmem:[%s3382_s15 + $0x1c8] ss:$16 sps:$4 sm:$0xff]   ;;  %v2986_v13 = vld [vmem:[%s3382_s15 + $0x1ec] ss:$16 sps:$4 sm:$0xff]  }
  0xbc   : > { %1380 = vmatprep.mubr.bf16.mxu1 %v2910_v15  ;;  %2518 = vmatpush3.bf16.msra.mxu0 %v2995_v31  ;;  %v2989_v15 = vld [vmem:[%s3382_s15 + $0x1e8] ss:$16 sps:$4 sm:$0xff]   ;;  %s3116_s15 = scalar_lea.vmem %s3648_s17, 4096 }
  0xbd   : > { %2705 = vmatpush3.bf16.msra.mxu1 %v2995_v31  ;;  %2519 = vmatprep.subr.bf16.mxu0 %v2996_v32  ;;  %p3117_p12 = scmp.ne.s32.totalorder %s3648_s17, %s3116_s15  ;;  %p3124_p2 = scmp.lt.s32.totalorder %s3122_s21, %s3116_s15 }
  0xbe   : > { %2698 = vmatprep.subr.bf16.mxu1 %v2996_v32 }
  0xbf   : > { %p3118_p5 = pnand %p3117_p12, %p3721_p0  ;;  %p3125_p3 = por %p3124_p2, %p3123_p1 }
  0xc0   : > { %2520 = vmatpush3.bf16.msra.mxu0 %v2997_v33 }
  0xc1   : > { %2706 = vmatpush3.bf16.msra.mxu1 %v2997_v33  ;;  %2521 = vmatprep.subr.bf16.mxu0 %v2998_v38  ;;  %p3119_p10 = pneg %p3118_p5 }
  0xc2   : > { %1188 = vmatmul.mubr.bf16.gmra.mxu0 %v2912_v17  ;;  %2699 = vmatprep.subr.bf16.mxu1 %v2998_v38  ;;  %v476_v17 = vshrl.u32 %v475_v16, 7 }
  0xc3   : > { %1381 = vmatmul.mubr.bf16.gmra.mxu1 %v2913_v19  ;;  %1197 = vmatprep.mubr.bf16.mxu0 %v2914_v20  ;;  %v473_v20 = vld [vmem:[%s3696_s2] sm:$0x3]  ;;  %p3126_p9 = pnand %p3125_p3, %p3119_p10 }
  0xc4   : > { %1390 = vmatprep.mubr.bf16.mxu1 %v2916_v21  ;;  %2522 = vmatpush3.bf16.msra.mxu0 %v2999_v55  ;;  %v481_v18 = vsub.s32 1, %v476_v17  ;;  %v477_v19 = vsub.s32 0, %v476_v17 }
  0xc5   : > { %2707 = vmatpush3.bf16.msra.mxu1 %v2999_v55  ;;  %2523 = vmatprep.subr.bf16.mxu0 %v3000_v56 }
  0xc6   : > { %2700 = vmatprep.subr.bf16.mxu1 %v3000_v56  ;;  %v3463_v21 = vrot.slane %v473_v20, %v481_v18  ;;  %v3465_v22 = vrot.slane %v473_v20, %v477_v19 }
  0xc8   : > { %2524 = vmatpush3.bf16.msra.mxu0 %v3001_v57 }
  0xc9   : > { %2708 = vmatpush3.bf16.msra.mxu1 %v3001_v57 }
  0xca   : > { %1198 = vmatmul.mubr.bf16.gmra.mxu0 %v2918_v25 }
  0xcb   : > { %1391 = vmatmul.mubr.bf16.gmra.mxu1 %v2919_v26  ;;  %1207 = vmatprep.mubr.bf16.mxu0 %v2920_v28 }
  0xcc   : > { %1400 = vmatprep.mubr.bf16.mxu1 %v2922_v29 }
  0xd2   : > { %1208 = vmatmul.mubr.bf16.gmra.mxu0 %v2924_v34 }
  0xd3   : > { %1401 = vmatmul.mubr.bf16.gmra.mxu1 %v2925_v35  ;;  %1217 = vmatprep.mubr.bf16.mxu0 %v2926_v36 }
  0xd4   : > { %1410 = vmatprep.mubr.bf16.mxu1 %v2928_v37 }
  0xda   : > { %1218 = vmatmul.mubr.bf16.gmra.mxu0 %v2930_v39 }
  0xdb   : > { %1411 = vmatmul.mubr.bf16.gmra.mxu1 %v2931_v40  ;;  %1227 = vmatprep.mubr.bf16.mxu0 %v2932_v41  ;;  %v3471_v40 = vld [vmem:[#allocation8 + $0x38] sm:$0xff]  }
  0xdc   : > { %1420 = vmatprep.mubr.bf16.mxu1 %v2934_v42  ;;  %2645 = vmatprep.subr.bf16.mxu1 %v3471_v40 }
  0xe2   : > { %1228 = vmatmul.mubr.bf16.gmra.mxu0 %v2936_v43 }
  0xe3   : > { %1421 = vmatmul.mubr.bf16.gmra.mxu1 %v2937_v44  ;;  %1237 = vmatprep.mubr.bf16.mxu0 %v2938_v45 }
  0xe4   : > { %1430 = vmatprep.mubr.bf16.mxu1 %v2940_v46 }
  0xea   : > { %1238 = vmatmul.mubr.bf16.gmra.mxu0 %v2942_v47 }
  0xeb   : > { %1431 = vmatmul.mubr.bf16.gmra.mxu1 %v2943_v48  ;;  %1247 = vmatprep.mubr.bf16.mxu0 %v2944_v49 }
  0xec   : > { %1440 = vmatprep.mubr.bf16.mxu1 %v2946_v50 }
  0xf2   : > { %1248 = vmatmul.mubr.bf16.gmra.mxu0 %v2948_v51 }
  0xf3   : > { %1441 = vmatmul.mubr.bf16.gmra.mxu1 %v2949_v52  ;;  %1257 = vmatprep.mubr.bf16.mxu0 %v2950_v53 }
  0xf4   : > { %1450 = vmatprep.mubr.bf16.mxu1 %v2952_v54 }
  0xfa   : > { %1258 = vmatmul.mubr.bf16.gmra.mxu0 %v2954_v58 }
  0xfb   : > { %1451 = vmatmul.mubr.bf16.gmra.mxu1 %v2955_v59  ;;  %1267 = vmatprep.mubr.bf16.mxu0 %v2956_v60 }
  0xfc   : > { %1460 = vmatprep.mubr.bf16.mxu1 %v2958_v61 }
 0x102   : > { %1268 = vmatmul.mubr.bf16.gmra.mxu0 %v2960_v62 }
 0x103   : > { %1461 = vmatmul.mubr.bf16.gmra.mxu1 %v2961_v63  ;;  %1277 = vmatprep.mubr.bf16.mxu0 %v2962_v0 }
 0x104   : > { %1470 = vmatprep.mubr.bf16.mxu1 %v2964_v1 }
 0x10a   : > { %1278 = vmatmul.mubr.bf16.gmra.mxu0 %v2967_v2 }
 0x10b   : > { %1471 = vmatmul.mubr.bf16.gmra.mxu1 %v2968_v3  ;;  %1287 = vmatprep.mubr.bf16.mxu0 %v2970_v4 }
 0x10c   : > { %1480 = vmatprep.mubr.bf16.mxu1 %v2972_v5 }
 0x112   : > { %1288 = vmatmul.mubr.bf16.gmra.mxu0 %v2974_v6 }
 0x113   : > { %1481 = vmatmul.mubr.bf16.gmra.mxu1 %v2975_v7  ;;  %1297 = vmatprep.mubr.bf16.mxu0 %v2976_v8 }
 0x114   : > { %1490 = vmatprep.mubr.bf16.mxu1 %v2978_v9 }
 0x11a   : > { %1298 = vmatmul.mubr.bf16.gmra.mxu0 %v2981_v10 }
 0x11b   : > { %1491 = vmatmul.mubr.bf16.gmra.mxu1 %v2982_v11  ;;  %1307 = vmatprep.mubr.bf16.mxu0 %v2984_v12 }
 0x11c   : > { %1500 = vmatprep.mubr.bf16.mxu1 %v2986_v13 }
 0x122   : > { %1308 = vmatmul.mubr.bf16.gmra.mxu0 %v2988_v14 }
 0x123   : > { %1501 = vmatmul.mubr.bf16.gmra.mxu1 %v2989_v15 }
 0x16a   : > { %v1159_v23 = vpop.f32.mrf.mxu0 }
 0x16b   : > { %v1352_v24 = vpop.f32.mrf.mxu1  ;;  %v1160_v28 = vadd.f32 %v1159_v23, %v3465_v22 }
 0x16c   : > { %v1161_v25 = vpop.f32.mrf.mxu0 }
 0x16d   : > { %v1354_v26 = vpop.f32.mrf.mxu1  ;;  %v1162_v27 = vadd.f32 %v1161_v25, %v3463_v21  ;;  %v1353_v37 = vadd.f32 %v1352_v24, %v1160_v28 }
 0x16e   : > { %v1163_v29 = vpop.f32.mrf.mxu0 }
 0x16f   : > { %v1356_v30 = vpop.f32.mrf.mxu1  ;;  %v1164_v31 = vadd.f32 %v1163_v29, %v3465_v22  ;;  %v1355_v34 = vadd.f32 %v1354_v26, %v1162_v27  ;;  %v1511_v48 = vmax.f32 %v1353_v37, 0.0 }
 0x170   : > { %v1165_v32 = vpop.f32.mrf.mxu0 }
 0x171   : > { %v1358_v33 = vpop.f32.mrf.mxu1  ;;  %v1357_v35 = vadd.f32 %v1356_v30, %v1164_v31  ;;  %v1166_v36 = vadd.f32 %v1165_v32, %v3463_v21  ;;  %v1512_v45 = vmax.f32 %v1355_v34, 0.0 }
 0x172   : > { %v1169_v38 = vpop.f32.mrf.mxu0 }
 0x173   : > { %v1362_v39 = vpop.f32.mrf.mxu1  ;;  %v1359_v41 = vadd.f32 %v1358_v33, %v1166_v36  ;;  %v1513_v42 = vmax.f32 %v1357_v35, 0.0  ;;  %v1170_v49 = vadd.f32 %v1169_v38, %v3465_v22 }
 0x174   : > { %v1171_v43 = vpop.f32.mrf.mxu0 }
 0x175   : > { %v1364_v44 = vpop.f32.mrf.mxu1  ;;  %v1514_v46 = vmax.f32 %v1359_v41, 0.0  ;;  %v1172_v47 = vadd.f32 %v1171_v43, %v3463_v21  ;;  %v1575_v54 = vpack.c.bf16 %v1513_v42, %v1511_v48  ;;  %v1363_v60 = vadd.f32 %v1362_v39, %v1170_v49 }
 0x176   : > { %v1173_v50 = vpop.f32.mrf.mxu0 }
 0x177   : > { %v1366_v51 = vpop.f32.mrf.mxu1  ;;  %v1576_v52 = vpack.c.bf16 %v1514_v46, %v1512_v45  ;;  %v1174_v53 = vadd.f32 %v1173_v50, %v3465_v22  ;;  %v1365_v57 = vadd.f32 %v1364_v44, %v1172_v47  ;;  %v1515_v6 = vmax.f32 %v1363_v60, 0.0 }
 0x178   : > { %v1175_v55 = vpop.f32.mrf.mxu0 }
 0x179   : > { %v1368_v56 = vpop.f32.mrf.mxu1  ;;  %v1367_v58 = vadd.f32 %v1366_v51, %v1174_v53  ;;  %v1176_v59 = vadd.f32 %v1175_v55, %v3463_v21  ;;  %1774 = vmatprep.mubr.bf16.mxu0 %v1576_v52  ;;  %v1516_v3 = vmax.f32 %v1365_v57, 0.0 }
 0x17a   : > { %v1179_v61 = vpop.f32.mrf.mxu0  ;;  %1775 = vmatmul.mubr.bf16.vlgmr.msra.gmra.mxu0 %v1575_v54 }
 0x17b   : > { %v1372_v62 = vpop.f32.mrf.mxu1  ;;  %v1369_v63 = vadd.f32 %v1368_v56, %v1176_v59  ;;  %v1517_v0 = vmax.f32 %v1367_v58, 0.0  ;;  %v1180_v7 = vadd.f32 %v1179_v61, %v3465_v22 }
 0x17c   : > { %v1181_v1 = vpop.f32.mrf.mxu0 }
 0x17d   : > { %v1374_v2 = vpop.f32.mrf.mxu1  ;;  %v1518_v4 = vmax.f32 %v1369_v63, 0.0  ;;  %v1182_v5 = vadd.f32 %v1181_v1, %v3463_v21  ;;  %v1577_v12 = vpack.c.bf16 %v1517_v0, %v1515_v6  ;;  %v1373_v18 = vadd.f32 %v1372_v62, %v1180_v7 }
 0x17e   : > { %v1183_v8 = vpop.f32.mrf.mxu0 }
 0x17f   : > { %v1376_v9 = vpop.f32.mrf.mxu1  ;;  %v1578_v10 = vpack.c.bf16 %v1518_v4, %v1516_v3  ;;  %v1184_v11 = vadd.f32 %v1183_v8, %v3465_v22  ;;  %v1375_v15 = vadd.f32 %v1374_v2, %v1182_v5  ;;  %v1519_v30 = vmax.f32 %v1373_v18, 0.0 }
 0x180   : > { %v1185_v13 = vpop.f32.mrf.mxu0 }
 0x181   : > { %v1378_v14 = vpop.f32.mrf.mxu1  ;;  %v1377_v16 = vadd.f32 %v1376_v9, %v1184_v11  ;;  %v1186_v17 = vadd.f32 %v1185_v13, %v3463_v21  ;;  %1782 = vmatprep.mubr.bf16.mxu0 %v1578_v10  ;;  %v1520_v27 = vmax.f32 %v1375_v15, 0.0 }
 0x182   : > { %v1189_v19 = vpop.f32.mrf.mxu0  ;;  %1783 = vmatmul.mubr.bf16.gmra.mxu0 %v1577_v12 }
 0x183   : > { %v1382_v20 = vpop.f32.mrf.mxu1  ;;  %v1379_v23 = vadd.f32 %v1378_v14, %v1186_v17  ;;  %v1521_v24 = vmax.f32 %v1377_v16, 0.0  ;;  %v1190_v31 = vadd.f32 %v1189_v19, %v3465_v22 }
 0x184   : > { %v1191_v25 = vpop.f32.mrf.mxu0 }
 0x185   : > { %v1384_v26 = vpop.f32.mrf.mxu1  ;;  %v1522_v28 = vmax.f32 %v1379_v23, 0.0  ;;  %v1192_v29 = vadd.f32 %v1191_v25, %v3463_v21  ;;  %v1579_v36 = vpack.c.bf16 %v1521_v24, %v1519_v30  ;;  %v1383_v43 = vadd.f32 %v1382_v20, %v1190_v31 }
 0x186   : > { %v1193_v32 = vpop.f32.mrf.mxu0 }
 0x187   : > { %v1386_v33 = vpop.f32.mrf.mxu1  ;;  %v1580_v34 = vpack.c.bf16 %v1522_v28, %v1520_v27  ;;  %v1194_v35 = vadd.f32 %v1193_v32, %v3465_v22  ;;  %v1385_v39 = vadd.f32 %v1384_v26, %v1192_v29  ;;  %v1523_v53 = vmax.f32 %v1383_v43, 0.0 }
 0x188   : > { %v1195_v37 = vpop.f32.mrf.mxu0 }
 0x189   : > { %v1388_v38 = vpop.f32.mrf.mxu1  ;;  %v1387_v41 = vadd.f32 %v1386_v33, %v1194_v35  ;;  %v1196_v42 = vadd.f32 %v1195_v37, %v3463_v21  ;;  %1790 = vmatprep.mubr.bf16.mxu0 %v1580_v34  ;;  %v1524_v50 = vmax.f32 %v1385_v39, 0.0 }
 0x18a   : > { %v1199_v44 = vpop.f32.mrf.mxu0  ;;  %1791 = vmatmul.mubr.bf16.gmra.mxu0 %v1579_v36 }
 0x18b   : > { %v1392_v45 = vpop.f32.mrf.mxu1  ;;  %v1389_v46 = vadd.f32 %v1388_v38, %v1196_v42  ;;  %v1525_v47 = vmax.f32 %v1387_v41, 0.0  ;;  %v1200_v54 = vadd.f32 %v1199_v44, %v3465_v22 }
 0x18c   : > { %v1201_v48 = vpop.f32.mrf.mxu0 }
 0x18d   : > { %v1394_v49 = vpop.f32.mrf.mxu1  ;;  %v1526_v51 = vmax.f32 %v1389_v46, 0.0  ;;  %v1202_v52 = vadd.f32 %v1201_v48, %v3463_v21  ;;  %v1581_v59 = vpack.c.bf16 %v1525_v47, %v1523_v53  ;;  %v1393_v1 = vadd.f32 %v1392_v45, %v1200_v54 }
 0x18e   : > { %v1203_v55 = vpop.f32.mrf.mxu0 }
 0x18f   : > { %v1396_v56 = vpop.f32.mrf.mxu1  ;;  %v1582_v57 = vpack.c.bf16 %v1526_v51, %v1524_v50  ;;  %v1204_v58 = vadd.f32 %v1203_v55, %v3465_v22  ;;  %v1395_v62 = vadd.f32 %v1394_v49, %v1202_v52  ;;  %v1527_v11 = vmax.f32 %v1393_v1, 0.0 }
 0x190   : > { %v1205_v60 = vpop.f32.mrf.mxu0 }
 0x191   : > { %v1398_v61 = vpop.f32.mrf.mxu1  ;;  %v1397_v63 = vadd.f32 %v1396_v56, %v1204_v58  ;;  %v1206_v0 = vadd.f32 %v1205_v60, %v3463_v21  ;;  %1798 = vmatprep.mubr.bf16.mxu0 %v1582_v57  ;;  %v1528_v8 = vmax.f32 %v1395_v62, 0.0 }
 0x192   : > { %v1209_v2 = vpop.f32.mrf.mxu0  ;;  %1799 = vmatmul.mubr.bf16.gmra.mxu0 %v1581_v59 }
 0x193   : > { %v1402_v3 = vpop.f32.mrf.mxu1  ;;  %v1399_v4 = vadd.f32 %v1398_v61, %v1206_v0  ;;  %v1529_v5 = vmax.f32 %v1397_v63, 0.0  ;;  %v1210_v12 = vadd.f32 %v1209_v2, %v3465_v22 }
 0x194   : > { %v1211_v6 = vpop.f32.mrf.mxu0 }
 0x195   : > { %v1404_v7 = vpop.f32.mrf.mxu1  ;;  %v1530_v9 = vmax.f32 %v1399_v4, 0.0  ;;  %v1212_v10 = vadd.f32 %v1211_v6, %v3463_v21  ;;  %v1583_v17 = vpack.c.bf16 %v1529_v5, %v1527_v11  ;;  %v1403_v25 = vadd.f32 %v1402_v3, %v1210_v12 }
 0x196   : > { %v1213_v13 = vpop.f32.mrf.mxu0 }
 0x197   : > { %v1406_v14 = vpop.f32.mrf.mxu1  ;;  %v1584_v15 = vpack.c.bf16 %v1530_v9, %v1528_v8  ;;  %v1214_v16 = vadd.f32 %v1213_v13, %v3465_v22  ;;  %v1405_v20 = vadd.f32 %v1404_v7, %v1212_v10  ;;  %v1531_v35 = vmax.f32 %v1403_v25, 0.0 }
 0x198   : > { %v1215_v18 = vpop.f32.mrf.mxu0 }
 0x199   : > { %v1408_v19 = vpop.f32.mrf.mxu1  ;;  %v1407_v23 = vadd.f32 %v1406_v14, %v1214_v16  ;;  %v1216_v24 = vadd.f32 %v1215_v18, %v3463_v21  ;;  %1806 = vmatprep.mubr.bf16.mxu0 %v1584_v15  ;;  %v1532_v32 = vmax.f32 %v1405_v20, 0.0 }
 0x19a   : > { %v1219_v26 = vpop.f32.mrf.mxu0  ;;  %1807 = vmatmul.mubr.bf16.gmra.mxu0 %v1583_v17 }
 0x19b   : > { %v1412_v27 = vpop.f32.mrf.mxu1  ;;  %v1409_v28 = vadd.f32 %v1408_v19, %v1216_v24  ;;  %v1533_v29 = vmax.f32 %v1407_v23, 0.0  ;;  %v1220_v36 = vadd.f32 %v1219_v26, %v3465_v22 }
 0x19c   : > { %v1221_v30 = vpop.f32.mrf.mxu0 }
 0x19d   : > { %v1414_v31 = vpop.f32.mrf.mxu1  ;;  %v1534_v33 = vmax.f32 %v1409_v28, 0.0  ;;  %v1222_v34 = vadd.f32 %v1221_v30, %v3463_v21  ;;  %v1585_v42 = vpack.c.bf16 %v1533_v29, %v1531_v35  ;;  %v1413_v48 = vadd.f32 %v1412_v27, %v1220_v36 }
 0x19e   : > { %v1223_v37 = vpop.f32.mrf.mxu0 }
 0x19f   : > { %v1416_v38 = vpop.f32.mrf.mxu1  ;;  %v1586_v39 = vpack.c.bf16 %v1534_v33, %v1532_v32  ;;  %v1224_v41 = vadd.f32 %v1223_v37, %v3465_v22  ;;  %v1415_v45 = vadd.f32 %v1414_v31, %v1222_v34  ;;  %v1535_v58 = vmax.f32 %v1413_v48, 0.0 }
 0x1a0   : > { %v1225_v43 = vpop.f32.mrf.mxu0 }
 0x1a1   : > { %v1418_v44 = vpop.f32.mrf.mxu1  ;;  %v1417_v46 = vadd.f32 %v1416_v38, %v1224_v41  ;;  %v1226_v47 = vadd.f32 %v1225_v43, %v3463_v21  ;;  %1814 = vmatprep.mubr.bf16.mxu0 %v1586_v39  ;;  %v1536_v55 = vmax.f32 %v1415_v45, 0.0 }
 0x1a2   : > { %v1229_v49 = vpop.f32.mrf.mxu0  ;;  %1815 = vmatmul.mubr.bf16.gmra.mxu0 %v1585_v42 }
 0x1a3   : > { %v1422_v50 = vpop.f32.mrf.mxu1  ;;  %v1419_v51 = vadd.f32 %v1418_v44, %v1226_v47  ;;  %v1537_v52 = vmax.f32 %v1417_v46, 0.0  ;;  %v1230_v59 = vadd.f32 %v1229_v49, %v3465_v22 }
 0x1a4   : > { %v1231_v53 = vpop.f32.mrf.mxu0 }
 0x1a5   : > { %v1424_v54 = vpop.f32.mrf.mxu1  ;;  %v1538_v56 = vmax.f32 %v1419_v51, 0.0  ;;  %v1232_v57 = vadd.f32 %v1231_v53, %v3463_v21  ;;  %v1587_v0 = vpack.c.bf16 %v1537_v52, %v1535_v58  ;;  %v1423_v6 = vadd.f32 %v1422_v50, %v1230_v59 }
 0x1a6   : > { %v1233_v60 = vpop.f32.mrf.mxu0 }
 0x1a7   : > { %v1426_v61 = vpop.f32.mrf.mxu1  ;;  %v1588_v62 = vpack.c.bf16 %v1538_v56, %v1536_v55  ;;  %v1234_v63 = vadd.f32 %v1233_v60, %v3465_v22  ;;  %v1425_v3 = vadd.f32 %v1424_v54, %v1232_v57  ;;  %v1539_v16 = vmax.f32 %v1423_v6, 0.0 }
 0x1a8   : > { %v1235_v1 = vpop.f32.mrf.mxu0 }
 0x1a9   : > { %v1428_v2 = vpop.f32.mrf.mxu1  ;;  %v1427_v4 = vadd.f32 %v1426_v61, %v1234_v63  ;;  %v1236_v5 = vadd.f32 %v1235_v1, %v3463_v21  ;;  %1822 = vmatprep.mubr.bf16.mxu0 %v1588_v62  ;;  %v1540_v13 = vmax.f32 %v1425_v3, 0.0 }
 0x1aa   : > { %v1239_v7 = vpop.f32.mrf.mxu0  ;;  %1823 = vmatmul.mubr.bf16.gmra.mxu0 %v1587_v0 }
 0x1ab   : > { %v1432_v8 = vpop.f32.mrf.mxu1  ;;  %v1429_v9 = vadd.f32 %v1428_v2, %v1236_v5  ;;  %v1541_v10 = vmax.f32 %v1427_v4, 0.0  ;;  %v1240_v17 = vadd.f32 %v1239_v7, %v3465_v22 }
 0x1ac   : > { %v1241_v11 = vpop.f32.mrf.mxu0 }
 0x1ad   : > { %v1434_v12 = vpop.f32.mrf.mxu1  ;;  %v1542_v14 = vmax.f32 %v1429_v9, 0.0  ;;  %v1242_v15 = vadd.f32 %v1241_v11, %v3463_v21  ;;  %v1589_v24 = vpack.c.bf16 %v1541_v10, %v1539_v16  ;;  %v1433_v30 = vadd.f32 %v1432_v8, %v1240_v17 }
 0x1ae   : > { %v1243_v18 = vpop.f32.mrf.mxu0 }
 0x1af   : > { %v1436_v19 = vpop.f32.mrf.mxu1  ;;  %v1590_v20 = vpack.c.bf16 %v1542_v14, %v1540_v13  ;;  %v1244_v23 = vadd.f32 %v1243_v18, %v3465_v22  ;;  %v1435_v27 = vadd.f32 %v1434_v12, %v1242_v15  ;;  %v1543_v41 = vmax.f32 %v1433_v30, 0.0 }
 0x1b0   : > { %v1245_v25 = vpop.f32.mrf.mxu0 }
 0x1b1   : > { %v1438_v26 = vpop.f32.mrf.mxu1  ;;  %v1437_v28 = vadd.f32 %v1436_v19, %v1244_v23  ;;  %v1246_v29 = vadd.f32 %v1245_v25, %v3463_v21  ;;  %1830 = vmatprep.mubr.bf16.mxu0 %v1590_v20  ;;  %v1544_v37 = vmax.f32 %v1435_v27, 0.0 }
 0x1b2   : > { %v1249_v31 = vpop.f32.mrf.mxu0  ;;  %1831 = vmatmul.mubr.bf16.gmra.mxu0 %v1589_v24 }
 0x1b3   : > { %v1442_v32 = vpop.f32.mrf.mxu1  ;;  %v1439_v33 = vadd.f32 %v1438_v26, %v1246_v29  ;;  %v1545_v34 = vmax.f32 %v1437_v28, 0.0  ;;  %v1250_v42 = vadd.f32 %v1249_v31, %v3465_v22 }
 0x1b4   : > { %v1251_v35 = vpop.f32.mrf.mxu0 }
 0x1b5   : > { %v1444_v36 = vpop.f32.mrf.mxu1  ;;  %v1546_v38 = vmax.f32 %v1439_v33, 0.0  ;;  %v1252_v39 = vadd.f32 %v1251_v35, %v3463_v21  ;;  %v1591_v47 = vpack.c.bf16 %v1545_v34, %v1543_v41  ;;  %v1443_v53 = vadd.f32 %v1442_v32, %v1250_v42 }
 0x1b6   : > { %v1253_v43 = vpop.f32.mrf.mxu0 }
 0x1b7   : > { %v1446_v44 = vpop.f32.mrf.mxu1  ;;  %v1592_v45 = vpack.c.bf16 %v1546_v38, %v1544_v37  ;;  %v1254_v46 = vadd.f32 %v1253_v43, %v3465_v22  ;;  %v1445_v50 = vadd.f32 %v1444_v36, %v1252_v39  ;;  %v1547_v63 = vmax.f32 %v1443_v53, 0.0 }
 0x1b8   : > { %v1255_v48 = vpop.f32.mrf.mxu0 }
 0x1b9   : > { %v1448_v49 = vpop.f32.mrf.mxu1  ;;  %v1447_v51 = vadd.f32 %v1446_v44, %v1254_v46  ;;  %v1256_v52 = vadd.f32 %v1255_v48, %v3463_v21  ;;  %1838 = vmatprep.mubr.bf16.mxu0 %v1592_v45  ;;  %v1548_v60 = vmax.f32 %v1445_v50, 0.0 }
 0x1ba   : > { %v1259_v54 = vpop.f32.mrf.mxu0  ;;  %1839 = vmatmul.mubr.bf16.gmra.mxu0 %v1591_v47 }
 0x1bb   : > { %v1452_v55 = vpop.f32.mrf.mxu1  ;;  %v1449_v56 = vadd.f32 %v1448_v49, %v1256_v52  ;;  %v1549_v57 = vmax.f32 %v1447_v51, 0.0  ;;  %v1260_v0 = vadd.f32 %v1259_v54, %v3465_v22 }
 0x1bc   : > { %v1261_v58 = vpop.f32.mrf.mxu0 }
 0x1bd   : > { %v1454_v59 = vpop.f32.mrf.mxu1  ;;  %v1550_v61 = vmax.f32 %v1449_v56, 0.0  ;;  %v1262_v62 = vadd.f32 %v1261_v58, %v3463_v21  ;;  %v1593_v5 = vpack.c.bf16 %v1549_v57, %v1547_v63  ;;  %v1453_v11 = vadd.f32 %v1452_v55, %v1260_v0 }
 0x1be   : > { %v1263_v1 = vpop.f32.mrf.mxu0 }
 0x1bf   : > { %v1456_v2 = vpop.f32.mrf.mxu1  ;;  %v1594_v3 = vpack.c.bf16 %v1550_v61, %v1548_v60  ;;  %v1264_v4 = vadd.f32 %v1263_v1, %v3465_v22  ;;  %v1455_v8 = vadd.f32 %v1454_v59, %v1262_v62  ;;  %v1551_v23 = vmax.f32 %v1453_v11, 0.0 }
 0x1c0   : > { %v1265_v6 = vpop.f32.mrf.mxu0 }
 0x1c1   : > { %v1458_v7 = vpop.f32.mrf.mxu1  ;;  %v1457_v9 = vadd.f32 %v1456_v2, %v1264_v4  ;;  %v1266_v10 = vadd.f32 %v1265_v6, %v3463_v21  ;;  %1846 = vmatprep.mubr.bf16.mxu0 %v1594_v3  ;;  %v1552_v18 = vmax.f32 %v1455_v8, 0.0 }
 0x1c2   : > { %v1269_v12 = vpop.f32.mrf.mxu0  ;;  %1847 = vmatmul.mubr.bf16.gmra.mxu0 %v1593_v5 }
 0x1c3   : > { %v1462_v13 = vpop.f32.mrf.mxu1  ;;  %v1459_v14 = vadd.f32 %v1458_v7, %v1266_v10  ;;  %v1553_v15 = vmax.f32 %v1457_v9, 0.0  ;;  %v1270_v24 = vadd.f32 %v1269_v12, %v3465_v22 }
 0x1c4   : > { %v1271_v16 = vpop.f32.mrf.mxu0 }
 0x1c5   : > { %v1464_v17 = vpop.f32.mrf.mxu1  ;;  %v1554_v19 = vmax.f32 %v1459_v14, 0.0  ;;  %v1272_v20 = vadd.f32 %v1271_v16, %v3463_v21  ;;  %v1595_v29 = vpack.c.bf16 %v1553_v15, %v1551_v23  ;;  %v1463_v35 = vadd.f32 %v1462_v13, %v1270_v24  ;;  %v3003_v13 = vld [vmem:[#allocation8 + $0x30] sm:$0xff]  }
 0x1c6   : > { %v1273_v25 = vpop.f32.mrf.mxu0 }
 0x1c7   : > { %v1466_v26 = vpop.f32.mrf.mxu1  ;;  %v1596_v27 = vpack.c.bf16 %v1554_v19, %v1552_v18  ;;  %v1274_v28 = vadd.f32 %v1273_v25, %v3465_v22  ;;  %v1465_v32 = vadd.f32 %v1464_v17, %v1272_v20  ;;  %v1555_v46 = vmax.f32 %v1463_v35, 0.0 }
 0x1c8   : > { %v1275_v30 = vpop.f32.mrf.mxu0 }
 0x1c9   : > { %v1468_v31 = vpop.f32.mrf.mxu1  ;;  %v1467_v33 = vadd.f32 %v1466_v26, %v1274_v28  ;;  %v1276_v34 = vadd.f32 %v1275_v30, %v3463_v21  ;;  %1854 = vmatprep.mubr.bf16.mxu0 %v1596_v27  ;;  %v1556_v43 = vmax.f32 %v1465_v32, 0.0  ;;  %v3004_v26 = vld [vmem:[#allocation8 + $0x28] sm:$0xff]  }
 0x1ca   : > { %v1279_v36 = vpop.f32.mrf.mxu0  ;;  %1855 = vmatmul.mubr.bf16.gmra.mxu0 %v1595_v29 }
 0x1cb   : > { %v1472_v37 = vpop.f32.mrf.mxu1  ;;  %v1469_v38 = vadd.f32 %v1468_v31, %v1276_v34  ;;  %v1557_v39 = vmax.f32 %v1467_v33, 0.0  ;;  %v1280_v47 = vadd.f32 %v1279_v36, %v3465_v22 }
 0x1cc   : > { %v1281_v41 = vpop.f32.mrf.mxu0 }
 0x1cd   : > { %v1474_v42 = vpop.f32.mrf.mxu1  ;;  %v1558_v44 = vmax.f32 %v1469_v38, 0.0  ;;  %v1282_v45 = vadd.f32 %v1281_v41, %v3463_v21  ;;  %v1597_v52 = vpack.c.bf16 %v1557_v39, %v1555_v46  ;;  %v1473_v58 = vadd.f32 %v1472_v37, %v1280_v47  ;;  %v3005_v38 = vld [vmem:[#allocation8 + $0x20] sm:$0xff]  }
 0x1ce   : > { %v1283_v48 = vpop.f32.mrf.mxu0 }
 0x1cf   : > { %v1476_v49 = vpop.f32.mrf.mxu1  ;;  %v1598_v50 = vpack.c.bf16 %v1558_v44, %v1556_v43  ;;  %v1284_v51 = vadd.f32 %v1283_v48, %v3465_v22  ;;  %v1475_v55 = vadd.f32 %v1474_v42, %v1282_v45  ;;  %v1559_v4 = vmax.f32 %v1473_v58, 0.0 }
 0x1d0   : > { %v1285_v53 = vpop.f32.mrf.mxu0 }
 0x1d1   : > { %v1478_v54 = vpop.f32.mrf.mxu1  ;;  %v1477_v56 = vadd.f32 %v1476_v49, %v1284_v51  ;;  %v1286_v57 = vadd.f32 %v1285_v53, %v3463_v21  ;;  %1862 = vmatprep.mubr.bf16.mxu0 %v1598_v50  ;;  %v1560_v1 = vmax.f32 %v1475_v55, 0.0  ;;  %v3006_v50 = vld [vmem:[#allocation8 + $0x18] sm:$0xff]  }
 0x1d2   : > { %v1289_v59 = vpop.f32.mrf.mxu0  ;;  %1863 = vmatmul.mubr.bf16.gmra.mxu0 %v1597_v52 }
 0x1d3   : > { %v1482_v60 = vpop.f32.mrf.mxu1  ;;  %v1479_v61 = vadd.f32 %v1478_v54, %v1286_v57  ;;  %v1561_v62 = vmax.f32 %v1477_v56, 0.0  ;;  %v1290_v5 = vadd.f32 %v1289_v59, %v3465_v22 }
 0x1d4   : > { %v1291_v63 = vpop.f32.mrf.mxu0 }
 0x1d5   : > { %v1484_v0 = vpop.f32.mrf.mxu1  ;;  %v1562_v2 = vmax.f32 %v1479_v61, 0.0  ;;  %v1292_v3 = vadd.f32 %v1291_v63, %v3463_v21  ;;  %v1599_v10 = vpack.c.bf16 %v1561_v62, %v1559_v4  ;;  %v1483_v17 = vadd.f32 %v1482_v60, %v1290_v5  ;;  %v3007_v62 = vld [vmem:[#allocation8 + $0x10] sm:$0xff]  }
 0x1d6   : > { %v1293_v6 = vpop.f32.mrf.mxu0 }
 0x1d7   : > { %v1486_v7 = vpop.f32.mrf.mxu1  ;;  %v1600_v8 = vpack.c.bf16 %v1562_v2, %v1560_v1  ;;  %v1294_v9 = vadd.f32 %v1293_v6, %v3465_v22  ;;  %v1485_v14 = vadd.f32 %v1484_v0, %v1292_v3  ;;  %v1563_v30 = vmax.f32 %v1483_v17, 0.0  ;;  %v3008_v6 = vld [vmem:[#allocation8 + $0x8] sm:$0xff]  }
 0x1d8   : > { %v1295_v11 = vpop.f32.mrf.mxu0 }
 0x1d9   : > { %v1488_v12 = vpop.f32.mrf.mxu1  ;;  %v1487_v15 = vadd.f32 %v1486_v7, %v1294_v9  ;;  %v1296_v16 = vadd.f32 %v1295_v11, %v3463_v21  ;;  %1870 = vmatprep.mubr.bf16.mxu1 %v1600_v8  ;;  %v1564_v27 = vmax.f32 %v1485_v14, 0.0  ;;  %v3009_v11 = vld [vmem:[#allocation8] sm:$0xff]  }
 0x1da   : > { %v1299_v18 = vpop.f32.mrf.mxu0  ;;  %1871 = vmatmul.mubr.bf16.vlgmr.msra.gmra.mxu1 %v1599_v10  ;;  %v3538_v14 = vld [vmem:[%s3698_s4] ss:$0 sm:$0xff] }
 0x1db   : > { %v1492_v19 = vpop.f32.mrf.mxu1  ;;  %v1489_v20 = vadd.f32 %v1488_v12, %v1296_v16  ;;  %2646 = vmatpush3.bf16.msra.mxu1 %v3471_v40  ;;  %v1565_v23 = vmax.f32 %v1487_v15, 0.0  ;;  %v1300_v31 = vadd.f32 %v1299_v18, %v3465_v22 }
 0x1dc   : > { %v1301_v24 = vpop.f32.mrf.mxu0  ;;  %2647 = vmatprep.subr.bf16.mxu1 %v3003_v13 }
 0x1dd   : > { %v1494_v25 = vpop.f32.mrf.mxu1  ;;  %v1566_v28 = vmax.f32 %v1489_v20, 0.0  ;;  %v1302_v29 = vadd.f32 %v1301_v24, %v3463_v21  ;;  %v1601_v36 = vpack.c.bf16 %v1565_v23, %v1563_v30  ;;  %v1493_v43 = vadd.f32 %v1492_v19, %v1300_v31 }
 0x1de   : > { %v1303_v32 = vpop.f32.mrf.mxu0 }
 0x1df   : > { %v1496_v33 = vpop.f32.mrf.mxu1  ;;  %v1602_v34 = vpack.c.bf16 %v1566_v28, %v1564_v27  ;;  %v1304_v35 = vadd.f32 %v1303_v32, %v3465_v22  ;;  %2648 = vmatpush3.bf16.msra.mxu1 %v3003_v13  ;;  %v1495_v39 = vadd.f32 %v1494_v25, %v1302_v29  ;;  %v1567_v54 = vmax.f32 %v1493_v43, 0.0 }
 0x1e0   : > { %v1305_v40 = vpop.f32.mrf.mxu0  ;;  %2649 = vmatprep.subr.bf16.mxu1 %v3004_v26 }
 0x1e1   : > { %v1498_v37 = vpop.f32.mrf.mxu1  ;;  %v1497_v41 = vadd.f32 %v1496_v33, %v1304_v35  ;;  %v1306_v42 = vadd.f32 %v1305_v40, %v3463_v21  ;;  %1878 = vmatprep.mubr.bf16.mxu1 %v1602_v34  ;;  %v1568_v51 = vmax.f32 %v1495_v39, 0.0 }
 0x1e2   : > { %v1309_v44 = vpop.f32.mrf.mxu0  ;;  %1879 = vmatmul.mubr.bf16.gmra.mxu1 %v1601_v36 }
 0x1e3   : > { %v1502_v45 = vpop.f32.mrf.mxu1  ;;  %v1499_v46 = vadd.f32 %v1498_v37, %v1306_v42  ;;  %2650 = vmatpush3.bf16.msra.mxu1 %v3004_v26  ;;  %v1569_v47 = vmax.f32 %v1497_v41, 0.0  ;;  %v1310_v55 = vadd.f32 %v1309_v44, %v3465_v22 }
 0x1e4   : > { %v1311_v48 = vpop.f32.mrf.mxu0  ;;  %2651 = vmatprep.subr.bf16.mxu1 %v3005_v38 }
 0x1e5   : > { %v1504_v49 = vpop.f32.mrf.mxu1  ;;  %v1570_v52 = vmax.f32 %v1499_v46, 0.0  ;;  %v1312_v53 = vadd.f32 %v1311_v48, %v3463_v21  ;;  %v1603_v60 = vpack.c.bf16 %v1569_v47, %v1567_v54  ;;  %v1503_v2 = vadd.f32 %v1502_v45, %v1310_v55 }
 0x1e6   : > { %v1313_v56 = vpop.f32.mrf.mxu0 }
 0x1e7   : > { %v1506_v57 = vpop.f32.mrf.mxu1  ;;  %v1604_v58 = vpack.c.bf16 %v1570_v52, %v1568_v51  ;;  %v1314_v59 = vadd.f32 %v1313_v56, %v3465_v22  ;;  %2652 = vmatpush3.bf16.msra.mxu1 %v3005_v38  ;;  %v1505_v63 = vadd.f32 %v1504_v49, %v1312_v53  ;;  %v1571_v8 = vmax.f32 %v1503_v2, 0.0 }
 0x1e8   : > { %v1315_v61 = vpop.f32.mrf.mxu0  ;;  %2653 = vmatprep.subr.bf16.mxu1 %v3006_v50 }
 0x1e9   : > { %v1507_v0 = vadd.f32 %v1506_v57, %v1314_v59  ;;  %v1316_v1 = vadd.f32 %v1315_v61, %v3463_v21  ;;  %1886 = vmatprep.mubr.bf16.mxu1 %v1604_v58  ;;  %v1508_v3 = vpop.f32.mrf.mxu1  ;;  %v1572_v7 = vmax.f32 %v1505_v63, 0.0 }
 0x1ea   : > { %1887 = vmatmul.mubr.bf16.gmra.mxu1 %v1603_v60 }
 0x1eb   : > { %v1509_v4 = vadd.f32 %v1508_v3, %v1316_v1  ;;  %2654 = vmatpush3.bf16.msra.mxu1 %v3006_v50  ;;  %v1573_v5 = vmax.f32 %v1507_v0, 0.0 }
 0x1ec   : > { %2655 = vmatprep.subr.bf16.mxu1 %v3007_v62 }
 0x1ed   : > { %v1574_v22 = vmax.f32 %v1509_v4, 0.0  ;;  %v1605_v10 = vpack.c.bf16 %v1573_v5, %v1571_v8 }
 0x1ef   : > { %v1606_v9 = vpack.c.bf16 %v1574_v22, %v1572_v7  ;;  %2656 = vmatpush3.bf16.msra.mxu1 %v3007_v62 }
 0x1f0   : > { %2657 = vmatprep.subr.bf16.mxu1 %v3008_v6 }
 0x1f1   : > { %1894 = vmatprep.mubr.bf16.mxu1 %v1606_v9 }
 0x1f2   : > { %1895 = vmatmul.mubr.bf16.gmra.mxu1 %v1605_v10 }
 0x1f3   : > { %2658 = vmatpush3.bf16.msra.mxu1 %v3008_v6 }
 0x1f4   : > { %2659 = vmatprep.subr.bf16.mxu1 %v3009_v11 }
 0x1f7   : > { %2660 = vmatpush3.bf16.msra.mxu1 %v3009_v11 }
 0x23a   : > { %v2525_v21 = vpop.f32.mrf.mxu0 }
 0x23c   : > { %v2526_v12 = vpop.f32.mrf.mxu0 }
 0x23d   : > { %v2527_v13 = vadd.f32 %v2526_v12, %v2525_v21 }
 0x23e   : > { %v2528_v15 = vpop.f32.mrf.mxu0 }
 0x23f   : > { %v1777_v17 = vadd.f32 %v2527_v13, %v3538_v14 }
 0x240   : > { %v2529_v16 = vpop.f32.mrf.mxu0 }
 0x241   : > { %v2530_v18 = vadd.f32 %v2529_v16, %v2528_v15  ;;  %v1903_v24 = vmax.f32 %v1777_v17, 0.0 }
 0x242   : > { %v2531_v19 = vpop.f32.mrf.mxu0 }
 0x243   : > { %v1780_v20 = vadd.f32 %v2530_v18, %v3538_v14 }
 0x244   : > { %v2532_v23 = vpop.f32.mrf.mxu0 }
 0x245   : > { %v1904_v25 = vmax.f32 %v1780_v20, 0.0  ;;  %v2533_v26 = vadd.f32 %v2532_v23, %v2531_v19 }
 0x246   : > { %v2534_v27 = vpop.f32.mrf.mxu0 }
 0x247   : > { %v1935_v28 = vpack.c.bf16 %v1904_v25, %v1903_v24  ;;  %v1785_v30 = vadd.f32 %v2533_v26, %v3538_v14 }
 0x248   : > { %v2535_v29 = vpop.f32.mrf.mxu0 }
 0x249   : > { %v2536_v31 = vadd.f32 %v2535_v29, %v2534_v27  ;;  %2661 = vmatprep.mubr.bf16.mxu1 %v1935_v28  ;;  %v1905_v35 = vmax.f32 %v1785_v30, 0.0 }
 0x24a   : > { %v2537_v32 = vpop.f32.mrf.mxu0 }
 0x24b   : > { %v1788_v33 = vadd.f32 %v2536_v31, %v3538_v14 }
 0x24c   : > { %v2538_v34 = vpop.f32.mrf.mxu0 }
 0x24d   : > { %v1906_v36 = vmax.f32 %v1788_v33, 0.0  ;;  %v2539_v40 = vadd.f32 %v2538_v34, %v2537_v32 }
 0x24e   : > { %v2540_v37 = vpop.f32.mrf.mxu0 }
 0x24f   : > { %v1936_v38 = vpack.c.bf16 %v1906_v36, %v1905_v35  ;;  %v1793_v41 = vadd.f32 %v2539_v40, %v3538_v14 }
 0x250   : > { %v2541_v39 = vpop.f32.mrf.mxu0 }
 0x251   : > { %v2542_v42 = vadd.f32 %v2541_v39, %v2540_v37  ;;  %2662 = vmatmul.mubr.bf16.vlgmr.msra.gmra.mxu1 %v1936_v38  ;;  %v1907_v46 = vmax.f32 %v1793_v41, 0.0 }
 0x252   : > { %v2543_v43 = vpop.f32.mrf.mxu0 }
 0x253   : > { %v1796_v44 = vadd.f32 %v2542_v42, %v3538_v14 }
 0x254   : > { %v2544_v45 = vpop.f32.mrf.mxu0 }
 0x255   : > { %v1908_v47 = vmax.f32 %v1796_v44, 0.0  ;;  %v2545_v48 = vadd.f32 %v2544_v45, %v2543_v43 }
 0x256   : > { %v2546_v49 = vpop.f32.mrf.mxu0 }
 0x257   : > { %v1937_v50 = vpack.c.bf16 %v1908_v47, %v1907_v46  ;;  %v1801_v52 = vadd.f32 %v2545_v48, %v3538_v14 }
 0x258   : > { %v2547_v51 = vpop.f32.mrf.mxu0 }
 0x259   : > { %v2548_v53 = vadd.f32 %v2547_v51, %v2546_v49  ;;  %2665 = vmatprep.mubr.bf16.mxu1 %v1937_v50  ;;  %v1909_v57 = vmax.f32 %v1801_v52, 0.0 }
 0x25a   : > { %v2549_v54 = vpop.f32.mrf.mxu0 }
 0x25b   : > { %v1804_v55 = vadd.f32 %v2548_v53, %v3538_v14 }
 0x25c   : > { %v2550_v56 = vpop.f32.mrf.mxu0 }
 0x25d   : > { %v1910_v58 = vmax.f32 %v1804_v55, 0.0  ;;  %v2551_v59 = vadd.f32 %v2550_v56, %v2549_v54 }
 0x25e   : > { %v2552_v60 = vpop.f32.mrf.mxu0 }
 0x25f   : > { %v1938_v61 = vpack.c.bf16 %v1910_v58, %v1909_v57  ;;  %v1809_v63 = vadd.f32 %v2551_v59, %v3538_v14 }
 0x260   : > { %v2553_v62 = vpop.f32.mrf.mxu0 }
 0x261   : > { %v2554_v0 = vadd.f32 %v2553_v62, %v2552_v60  ;;  %2666 = vmatmul.mubr.bf16.gmra.mxu1 %v1938_v61  ;;  %v1911_v4 = vmax.f32 %v1809_v63, 0.0 }
 0x262   : > { %v2555_v1 = vpop.f32.mrf.mxu0 }
 0x263   : > { %v1812_v2 = vadd.f32 %v2554_v0, %v3538_v14 }
 0x264   : > { %v2556_v3 = vpop.f32.mrf.mxu0 }
 0x265   : > { %v1912_v5 = vmax.f32 %v1812_v2, 0.0  ;;  %v2557_v6 = vadd.f32 %v2556_v3, %v2555_v1 }
 0x266   : > { %v2558_v7 = vpop.f32.mrf.mxu0 }
 0x267   : > { %v1939_v22 = vpack.c.bf16 %v1912_v5, %v1911_v4  ;;  %v1817_v9 = vadd.f32 %v2557_v6, %v3538_v14 }
 0x268   : > { %v2559_v8 = vpop.f32.mrf.mxu0 }
 0x269   : > { %v2560_v10 = vadd.f32 %v2559_v8, %v2558_v7  ;;  %2669 = vmatprep.mubr.bf16.mxu1 %v1939_v22  ;;  %v1913_v13 = vmax.f32 %v1817_v9, 0.0 }
 0x26a   : > { %v2561_v11 = vpop.f32.mrf.mxu0 }
 0x26b   : > { %v1820_v21 = vadd.f32 %v2560_v10, %v3538_v14 }
 0x26c   : > { %v2562_v12 = vpop.f32.mrf.mxu0 }
 0x26d   : > { %v1914_v15 = vmax.f32 %v1820_v21, 0.0  ;;  %v2563_v16 = vadd.f32 %v2562_v12, %v2561_v11 }
 0x26e   : > { %v2564_v17 = vpop.f32.mrf.mxu0 }
 0x26f   : > { %v1940_v18 = vpack.c.bf16 %v1914_v15, %v1913_v13  ;;  %v1825_v20 = vadd.f32 %v2563_v16, %v3538_v14 }
 0x270   : > { %v2565_v19 = vpop.f32.mrf.mxu0 }
 0x271   : > { %v2566_v23 = vadd.f32 %v2565_v19, %v2564_v17  ;;  %2670 = vmatmul.mubr.bf16.gmra.mxu1 %v1940_v18  ;;  %v1915_v27 = vmax.f32 %v1825_v20, 0.0 }
 0x272   : > { %v2567_v24 = vpop.f32.mrf.mxu0 }
 0x273   : > { %v1828_v25 = vadd.f32 %v2566_v23, %v3538_v14 }
 0x274   : > { %v2568_v26 = vpop.f32.mrf.mxu0 }
 0x275   : > { %v1916_v28 = vmax.f32 %v1828_v25, 0.0  ;;  %v2569_v29 = vadd.f32 %v2568_v26, %v2567_v24 }
 0x276   : > { %v2570_v30 = vpop.f32.mrf.mxu0 }
 0x277   : > { %v1941_v31 = vpack.c.bf16 %v1916_v28, %v1915_v27  ;;  %v1833_v33 = vadd.f32 %v2569_v29, %v3538_v14 }
 0x278   : > { %v2571_v32 = vpop.f32.mrf.mxu0 }
 0x279   : > { %v2572_v34 = vadd.f32 %v2571_v32, %v2570_v30  ;;  %2673 = vmatprep.mubr.bf16.mxu1 %v1941_v31  ;;  %v1917_v37 = vmax.f32 %v1833_v33, 0.0 }
 0x27a   : > { %v2573_v35 = vpop.f32.mrf.mxu0 }
 0x27b   : > { %v1836_v36 = vadd.f32 %v2572_v34, %v3538_v14 }
 0x27c   : > { %v2574_v40 = vpop.f32.mrf.mxu0 }
 0x27d   : > { %v1918_v38 = vmax.f32 %v1836_v36, 0.0  ;;  %v2575_v39 = vadd.f32 %v2574_v40, %v2573_v35 }
 0x27e   : > { %v2576_v41 = vpop.f32.mrf.mxu0 }
 0x27f   : > { %v1942_v42 = vpack.c.bf16 %v1918_v38, %v1917_v37  ;;  %v1841_v44 = vadd.f32 %v2575_v39, %v3538_v14 }
 0x280   : > { %v2577_v43 = vpop.f32.mrf.mxu0 }
 0x281   : > { %v2578_v45 = vadd.f32 %v2577_v43, %v2576_v41  ;;  %2674 = vmatmul.mubr.bf16.gmra.mxu1 %v1942_v42  ;;  %v1919_v49 = vmax.f32 %v1841_v44, 0.0 }
 0x282   : > { %v2579_v46 = vpop.f32.mrf.mxu0 }
 0x283   : > { %v1844_v47 = vadd.f32 %v2578_v45, %v3538_v14 }
 0x284   : > { %v2580_v48 = vpop.f32.mrf.mxu0 }
 0x285   : > { %v1920_v50 = vmax.f32 %v1844_v47, 0.0  ;;  %v2581_v51 = vadd.f32 %v2580_v48, %v2579_v46 }
 0x286   : > { %v2582_v52 = vpop.f32.mrf.mxu0 }
 0x287   : > { %v1943_v53 = vpack.c.bf16 %v1920_v50, %v1919_v49  ;;  %v1849_v55 = vadd.f32 %v2581_v51, %v3538_v14 }
 0x288   : > { %v2583_v54 = vpop.f32.mrf.mxu0 }
 0x289   : > { %v2584_v56 = vadd.f32 %v2583_v54, %v2582_v52  ;;  %2677 = vmatprep.mubr.bf16.mxu1 %v1943_v53  ;;  %v1921_v60 = vmax.f32 %v1849_v55, 0.0 }
 0x28a   : > { %v2585_v57 = vpop.f32.mrf.mxu0 }
 0x28b   : > { %v1852_v58 = vadd.f32 %v2584_v56, %v3538_v14 }
 0x28c   : > { %v2586_v59 = vpop.f32.mrf.mxu0 }
 0x28d   : > { %v1922_v61 = vmax.f32 %v1852_v58, 0.0  ;;  %v2587_v62 = vadd.f32 %v2586_v59, %v2585_v57 }
 0x28e   : > { %v2588_v63 = vpop.f32.mrf.mxu0 }
 0x28f   : > { %v1944_v0 = vpack.c.bf16 %v1922_v61, %v1921_v60  ;;  %v1857_v2 = vadd.f32 %v2587_v62, %v3538_v14 }
 0x290   : > { %v2589_v1 = vpop.f32.mrf.mxu0 }
 0x291   : > { %v2590_v3 = vadd.f32 %v2589_v1, %v2588_v63  ;;  %2678 = vmatmul.mubr.bf16.gmra.mxu1 %v1944_v0  ;;  %v1923_v7 = vmax.f32 %v1857_v2, 0.0  ;;  %v3576_v0 = vld [vmem:[%s3700_s6] ss:$0 sm:$0xff] }
 0x292   : > { %v2591_v4 = vpop.f32.mrf.mxu0 }
 0x293   : > { %v1860_v5 = vadd.f32 %v2590_v3, %v3538_v14 }
 0x294   : > { %v2592_v6 = vpop.f32.mrf.mxu0 }
 0x295   : > { %v1924_v22 = vmax.f32 %v1860_v5, 0.0  ;;  %v2593_v8 = vadd.f32 %v2592_v6, %v2591_v4 }
 0x296   : > { %v2594_v9 = vpop.f32.mrf.mxu0 }
 0x297   : > { %v1945_v10 = vpack.c.bf16 %v1924_v22, %v1923_v7  ;;  %v1865_v21 = vadd.f32 %v2593_v8, %v3538_v14 }
 0x298   : > { %v2595_v11 = vpop.f32.mrf.mxu0 }
 0x299   : > { %v2596_v12 = vadd.f32 %v2595_v11, %v2594_v9  ;;  %2681 = vmatprep.mubr.bf16.mxu1 %v1945_v10  ;;  %v1925_v17 = vmax.f32 %v1865_v21, 0.0 }
 0x29a   : > { %v2597_v13 = vpop.f32.mrf.mxu1 }
 0x29b   : > { %v1868_v15 = vadd.f32 %v2596_v12, %v3538_v14 }
 0x29c   : > { %v2598_v16 = vpop.f32.mrf.mxu1 }
 0x29d   : > { %v1926_v18 = vmax.f32 %v1868_v15, 0.0  ;;  %v2599_v19 = vadd.f32 %v2598_v16, %v2597_v13 }
 0x29e   : > { %v2600_v20 = vpop.f32.mrf.mxu1 }
 0x29f   : > { %v1946_v23 = vpack.c.bf16 %v1926_v18, %v1925_v17  ;;  %v1873_v25 = vadd.f32 %v2599_v19, %v3538_v14 }
 0x2a0   : > { %v2601_v24 = vpop.f32.mrf.mxu1 }
 0x2a1   : > { %v2602_v26 = vadd.f32 %v2601_v24, %v2600_v20  ;;  %2682 = vmatmul.mubr.bf16.gmra.mxu1 %v1946_v23  ;;  %v1927_v30 = vmax.f32 %v1873_v25, 0.0 }
 0x2a2   : > { %v2603_v27 = vpop.f32.mrf.mxu1 }
 0x2a3   : > { %v1876_v28 = vadd.f32 %v2602_v26, %v3538_v14 }
 0x2a4   : > { %v2604_v29 = vpop.f32.mrf.mxu1 }
 0x2a5   : > { %v1928_v31 = vmax.f32 %v1876_v28, 0.0  ;;  %v2605_v32 = vadd.f32 %v2604_v29, %v2603_v27 }
 0x2a6   : > { %v2606_v33 = vpop.f32.mrf.mxu1 }
 0x2a7   : > { %v1947_v34 = vpack.c.bf16 %v1928_v31, %v1927_v30  ;;  %v1881_v36 = vadd.f32 %v2605_v32, %v3538_v14 }
 0x2a8   : > { %v2607_v35 = vpop.f32.mrf.mxu1 }
 0x2a9   : > { %v2608_v40 = vadd.f32 %v2607_v35, %v2606_v33  ;;  %2685 = vmatprep.mubr.bf16.mxu1 %v1947_v34  ;;  %v1929_v41 = vmax.f32 %v1881_v36, 0.0 }
 0x2aa   : > { %v2609_v37 = vpop.f32.mrf.mxu1 }
 0x2ab   : > { %v1884_v38 = vadd.f32 %v2608_v40, %v3538_v14 }
 0x2ac   : > { %v2610_v39 = vpop.f32.mrf.mxu1 }
 0x2ad   : > { %v1930_v42 = vmax.f32 %v1884_v38, 0.0  ;;  %v2611_v43 = vadd.f32 %v2610_v39, %v2609_v37 }
 0x2ae   : > { %v2612_v44 = vpop.f32.mrf.mxu1 }
 0x2af   : > { %v1948_v45 = vpack.c.bf16 %v1930_v42, %v1929_v41  ;;  %v1889_v47 = vadd.f32 %v2611_v43, %v3538_v14 }
 0x2b0   : > { %v2613_v46 = vpop.f32.mrf.mxu1 }
 0x2b1   : > { %v2614_v48 = vadd.f32 %v2613_v46, %v2612_v44  ;;  %2686 = vmatmul.mubr.bf16.gmra.mxu1 %v1948_v45  ;;  %v1931_v52 = vmax.f32 %v1889_v47, 0.0 }
 0x2b2   : > { %v2615_v49 = vpop.f32.mrf.mxu1 }
 0x2b3   : > { %v1892_v50 = vadd.f32 %v2614_v48, %v3538_v14 }
 0x2b4   : > { %v2616_v51 = vpop.f32.mrf.mxu1 }
 0x2b5   : > { %v1932_v53 = vmax.f32 %v1892_v50, 0.0  ;;  %v2617_v54 = vadd.f32 %v2616_v51, %v2615_v49 }
 0x2b6   : > { %v2618_v55 = vpop.f32.mrf.mxu1 }
 0x2b7   : > { %v1949_v56 = vpack.c.bf16 %v1932_v53, %v1931_v52  ;;  %v1897_v58 = vadd.f32 %v2617_v54, %v3538_v14 }
 0x2b8   : > { %v2619_v57 = vpop.f32.mrf.mxu1 }
 0x2b9   : > { %v2620_v59 = vadd.f32 %v2619_v57, %v2618_v55  ;;  %2689 = vmatprep.mubr.bf16.mxu1 %v1949_v56  ;;  %v1933_v61 = vmax.f32 %v1897_v58, 0.0 }
 0x2bb   : > { %v1900_v60 = vadd.f32 %v2620_v59, %v3538_v14 }
 0x2bd   : > { %v1934_v62 = vmax.f32 %v1900_v60, 0.0 }
 0x2bf   : > { %v1950_v63 = vpack.c.bf16 %v1934_v62, %v1933_v61 }
 0x2c1   : > { %2690 = vmatmul.mubr.bf16.gmra.mxu1 %v1950_v63 }
 0x311   : > { %v2663_v1 = vpop.f32.mrf.mxu1 }
 0x312   : > { %v2065_v2 = vadd.f32 %v2663_v1, %v3576_v0 }
 0x313   : > { %v2056_v3 = vpop.f32.mrf.mxu1 }
 0x314   : > { %2185 = vst [vmem:[%s3579_s22 + $0x10] sm:$0xff] %v2065_v2  ;;  %v2057_v14 = vadd.f32 %v3576_v0, %v2056_v3 }
 0x315   : > { %v2664_v4 = vpop.f32.mrf.mxu1 }
 0x316   : > { %2183 = vst [vmem:[%s3579_s22] sm:$0xff] %v2057_v14  ;;  %v2068_v5 = vadd.f32 %v2664_v4, %v3576_v0 }
 0x317   : > { %v2059_v6 = vpop.f32.mrf.mxu1 }
 0x318   : > { %2186 = vst [vmem:[%s3579_s22 + $0x18] sm:$0xff] %v2068_v5  ;;  %v2060_v7 = vadd.f32 %v3576_v0, %v2059_v6 }
 0x31a   : > { %2184 = vst [vmem:[%s3579_s22 + $0x8] sm:$0xff] %v2060_v7 }
 0x321   : > { %v2667_v22 = vpop.f32.mrf.mxu1 }
 0x322   : > { %v2081_v8 = vadd.f32 %v2667_v22, %v3576_v0 }
 0x323   : > { %v2072_v9 = vpop.f32.mrf.mxu1 }
 0x324   : > { %2189 = vst [vmem:[%s3579_s22 + $0x30] sm:$0xff] %v2081_v8  ;;  %v2073_v10 = vadd.f32 %v3576_v0, %v2072_v9 }
 0x325   : > { %v2668_v11 = vpop.f32.mrf.mxu1 }
 0x326   : > { %2187 = vst [vmem:[%s3579_s22 + $0x20] sm:$0xff] %v2073_v10  ;;  %v2084_v21 = vadd.f32 %v2668_v11, %v3576_v0 }
 0x327   : > { %v2075_v12 = vpop.f32.mrf.mxu1 }
 0x328   : > { %2190 = vst [vmem:[%s3579_s22 + $0x38] sm:$0xff] %v2084_v21  ;;  %v2076_v13 = vadd.f32 %v3576_v0, %v2075_v12 }
 0x32a   : > { %2188 = vst [vmem:[%s3579_s22 + $0x28] sm:$0xff] %v2076_v13 }
 0x331   : > { %v2671_v15 = vpop.f32.mrf.mxu1 }
 0x332   : > { %v2097_v16 = vadd.f32 %v2671_v15, %v3576_v0 }
 0x333   : > { %v2088_v17 = vpop.f32.mrf.mxu1 }
 0x334   : > { %2193 = vst [vmem:[%s3579_s22 + $0x50] sm:$0xff] %v2097_v16  ;;  %v2089_v18 = vadd.f32 %v3576_v0, %v2088_v17 }
 0x335   : > { %v2672_v19 = vpop.f32.mrf.mxu1 }
 0x336   : > { %2191 = vst [vmem:[%s3579_s22 + $0x40] sm:$0xff] %v2089_v18  ;;  %v2100_v20 = vadd.f32 %v2672_v19, %v3576_v0 }
 0x337   : > { %v2091_v23 = vpop.f32.mrf.mxu1 }
 0x338   : > { %2194 = vst [vmem:[%s3579_s22 + $0x58] sm:$0xff] %v2100_v20  ;;  %v2092_v24 = vadd.f32 %v3576_v0, %v2091_v23 }
 0x33a   : > { %2192 = vst [vmem:[%s3579_s22 + $0x48] sm:$0xff] %v2092_v24 }
 0x341   : > { %v2675_v25 = vpop.f32.mrf.mxu1 }
 0x342   : > { %v2113_v26 = vadd.f32 %v2675_v25, %v3576_v0 }
 0x343   : > { %v2104_v27 = vpop.f32.mrf.mxu1 }
 0x344   : > { %2197 = vst [vmem:[%s3579_s22 + $0x70] sm:$0xff] %v2113_v26  ;;  %v2105_v28 = vadd.f32 %v3576_v0, %v2104_v27 }
 0x345   : > { %v2676_v29 = vpop.f32.mrf.mxu1 }
 0x346   : > { %2195 = vst [vmem:[%s3579_s22 + $0x60] sm:$0xff] %v2105_v28  ;;  %v2116_v30 = vadd.f32 %v2676_v29, %v3576_v0 }
 0x347   : > { %v2107_v31 = vpop.f32.mrf.mxu1 }
 0x348   : > { %2198 = vst [vmem:[%s3579_s22 + $0x78] sm:$0xff] %v2116_v30  ;;  %v2108_v32 = vadd.f32 %v3576_v0, %v2107_v31 }
 0x34a   : > { %2196 = vst [vmem:[%s3579_s22 + $0x68] sm:$0xff] %v2108_v32 }
 0x351   : > { %v2679_v33 = vpop.f32.mrf.mxu1 }
 0x352   : > { %v2129_v34 = vadd.f32 %v2679_v33, %v3576_v0 }
 0x353   : > { %v2120_v35 = vpop.f32.mrf.mxu1 }
 0x354   : > { %2201 = vst [vmem:[%s3579_s22 + $0x90] sm:$0xff] %v2129_v34  ;;  %v2121_v36 = vadd.f32 %v3576_v0, %v2120_v35 }
 0x355   : > { %v2680_v40 = vpop.f32.mrf.mxu1 }
 0x356   : > { %2199 = vst [vmem:[%s3579_s22 + $0x80] sm:$0xff] %v2121_v36  ;;  %v2132_v37 = vadd.f32 %v2680_v40, %v3576_v0 }
 0x357   : > { %v2123_v38 = vpop.f32.mrf.mxu1 }
 0x358   : > { %2202 = vst [vmem:[%s3579_s22 + $0x98] sm:$0xff] %v2132_v37  ;;  %v2124_v39 = vadd.f32 %v3576_v0, %v2123_v38 }
 0x35a   : > { %2200 = vst [vmem:[%s3579_s22 + $0x88] sm:$0xff] %v2124_v39 }
 0x361   : > { %v2683_v41 = vpop.f32.mrf.mxu1 }
 0x362   : > { %v2145_v42 = vadd.f32 %v2683_v41, %v3576_v0 }
 0x363   : > { %v2136_v43 = vpop.f32.mrf.mxu1 }
 0x364   : > { %2205 = vst [vmem:[%s3579_s22 + $0xb0] sm:$0xff] %v2145_v42  ;;  %v2137_v44 = vadd.f32 %v3576_v0, %v2136_v43 }
 0x365   : > { %v2684_v45 = vpop.f32.mrf.mxu1 }
 0x366   : > { %2203 = vst [vmem:[%s3579_s22 + $0xa0] sm:$0xff] %v2137_v44  ;;  %v2148_v46 = vadd.f32 %v2684_v45, %v3576_v0 }
 0x367   : > { %v2139_v47 = vpop.f32.mrf.mxu1 }
 0x368   : > { %2206 = vst [vmem:[%s3579_s22 + $0xb8] sm:$0xff] %v2148_v46  ;;  %v2140_v48 = vadd.f32 %v3576_v0, %v2139_v47 }
 0x36a   : > { %2204 = vst [vmem:[%s3579_s22 + $0xa8] sm:$0xff] %v2140_v48 }
 0x371   : > { %v2687_v49 = vpop.f32.mrf.mxu1 }
 0x372   : > { %v2161_v50 = vadd.f32 %v2687_v49, %v3576_v0 }
 0x373   : > { %v2152_v51 = vpop.f32.mrf.mxu1 }
 0x374   : > { %2209 = vst [vmem:[%s3579_s22 + $0xd0] sm:$0xff] %v2161_v50  ;;  %v2153_v52 = vadd.f32 %v3576_v0, %v2152_v51 }
 0x375   : > { %v2688_v53 = vpop.f32.mrf.mxu1 }
 0x376   : > { %2207 = vst [vmem:[%s3579_s22 + $0xc0] sm:$0xff] %v2153_v52  ;;  %v2164_v54 = vadd.f32 %v2688_v53, %v3576_v0 }
 0x377   : > { %v2155_v55 = vpop.f32.mrf.mxu1 }
 0x378   : > { %2210 = vst [vmem:[%s3579_s22 + $0xd8] sm:$0xff] %v2164_v54  ;;  %v2156_v56 = vadd.f32 %v3576_v0, %v2155_v55 }
 0x37a   : > { %2208 = vst [vmem:[%s3579_s22 + $0xc8] sm:$0xff] %v2156_v56 }
 0x381   : > { %v2691_v57 = vpop.f32.mrf.mxu1 }
 0x382   : > { %v2177_v58 = vadd.f32 %v2691_v57, %v3576_v0 }
 0x383   : > { %v2168_v59 = vpop.f32.mrf.mxu1 }
 0x384   : > { %2213 = vst [vmem:[%s3579_s22 + $0xf0] sm:$0xff] %v2177_v58  ;;  %v2169_v60 = vadd.f32 %v3576_v0, %v2168_v59 }
 0x385   : > { %v2692_v61 = vpop.f32.mrf.mxu1 }
 0x386   : > { %2211 = vst [vmem:[%s3579_s22 + $0xe0] sm:$0xff] %v2169_v60  ;;  %v2180_v62 = vadd.f32 %v2692_v61, %v3576_v0 }
 0x387   : > { %v2171_v63 = vpop.f32.mrf.mxu1 }
 0x388   : > { %2214 = vst [vmem:[%s3579_s22 + $0xf8] sm:$0xff] %v2180_v62  ;;  %v2172_v1 = vadd.f32 %v3576_v0, %v2171_v63 }
 0x38a   : > { %2212 = vst [vmem:[%s3579_s22 + $0xe8] sm:$0xff] %v2172_v1 }
 0x38b   : > { %3129 = shalt.err (!%p3126_p9)
}
 0x38c   : > { %s3130_s11 = scalar_lea.hbm %s3646_s10, 4096  ;;  %s3134_s20 = scalar_lea.hbm %s3701_s7, 8192 }
 0x38d   : > { %p3131_p7 = scmp.ne.s32.totalorder %s3646_s10, %s3130_s11  ;;  %p3135_p6 = scmp.lt.s32.totalorder %s3646_s10, %s3701_s7 }
 0x38e   : > { %p3136_p11 = scmp.lt.s32.totalorder %s3134_s20, %s3130_s11 }
 0x38f   : > { %p3132_p4 = pnand %p3131_p7, %p3721_p0 }
 0x390   : > { %p3137_p13 = por %p3136_p11, %p3135_p6 }
 0x391   : > { %p3133_p8 = pneg %p3132_p4 }
 0x393   : > { %p3138_p12 = pnand %p3137_p13, %p3133_p8 }
 0x395   : > { %3141 = shalt.err (!%p3138_p12)
}
 0x396   : > { %s3201_s23 = smov 128   ;;  %s3202_s1 = smov 8  }
 0x397   : > { %2723 = dma.vmem_to_hbm [thread:$0]  (%p3721_p0), %s3648_s17, 4096, %s3646_s10, %s2216_s28, %s3201_s23, %s3201_s23, %s3202_s1  }
 0x398 PF: > { %s2244_s15 = sand.u32 1, %s3176_s24   ;;  %p3722_p5 = scmp.ne.s32.totalorder %s3708_s8, 0 }
 0x399   : > { %p3723_p10 = scmp.ge.s32.totalorder %s3188_s27, 2  ;;  %s2245_s30 = scalar_lea.sflag [#allocation4], %s2244_s15 }
 0x39b   : > { %p2740_p1 = pnand %p3723_p10, %p3722_p5 }
 0x39d   : > { %p2741_p2 = pneg %p2740_p1 }
 0x39f   : > { %3171 = dma.done.wait (%p2741_p2), %s2245_s30, 4096  }
 0x3a0   : > { %3173 = vsyncadd (%p2741_p2), %s2245_s30, 4294963200  ;;  %p22_p3 = scmp.ge.s32.totalorder %s3315_s13, 4   ;;  %s3724_s24 = smov %s3180_s25 }
 0x3a1   : > { %s3725_s25 = smov %s3184_s26  ;;  %s3726_s26 = smov %s3333_s12 }
 0x3a2   : > { %s3727_s27 = smov %s3315_s13  ;;  %24 = sbr.rel (!%p22_p3) target bundleno = 9 (0x9), region = 105 }
 0x3a7   :  { %2250 = vsyncpa [#allocation3], 1 }
 0x3a8   :  { %2252 = vsyncpa [#allocation3 + $0x1], 1 }
 0x3a9   :  { %2253 = vsyncpa [#allocation6], 1 }
 0x3aa   :  { %2254 = vsyncpa [#allocation9], 1 }
 0x3ab   :  { %2255 = vsyncpa [#allocation4], 1 }
 0x3ac   :  { %2257 = vsyncpa [#allocation4 + $0x1], 1 }

</bundles_post_ra>
